<compile_context>
chip_gen: v7x
topology: tpu7x:2x2x1
jax: 0.10.0
libtpu: 0.0.40
codegen_flags: <defaults>
</compile_context>

<pallas_src>
import math
from functools import partial

import jax
import jax.numpy as jnp
from jax.experimental import pallas as pl
from jax.experimental.pallas import tpu as pltpu


# ----------------------------------------------------------------------------------
# helpers
# ----------------------------------------------------------------------------------
def _round_up(x, m):
    return ((x + m - 1) // m) * m


def _choose_tm(m):
    """Pick a large M-tile that divides M (rounded to 8) to avoid pad/slice copies."""
    mp8 = _round_up(max(m, 1), 8)
    for tm in (1024, 512, 256, 128):
        if mp8 % tm == 0:
            return tm, mp8
    if mp8 <= 1024:
        return mp8, mp8
    return 512, _round_up(m, 512)


_PARALLEL = pltpu.CompilerParams(dimension_semantics=("parallel",))


# ----------------------------------------------------------------------------------
# Pallas kernels
# ----------------------------------------------------------------------------------
def _mm_kernel(act, n_add, x_ref, w_ref, t_ref, *rest):
    """y = x @ w (bf16 -> f32 acc) + shift + sum(addends); optional ReLU."""
    add_refs = rest[:n_add]
    o_ref = rest[n_add]
    y = jnp.dot(x_ref[...], w_ref[...], preferred_element_type=jnp.float32)
    y = y + t_ref[...]
    for r in add_refs:
        y = y + r[...].astype(jnp.float32)
    if act == "relu":
        y = jnp.maximum(y, 0.0)
    o_ref[...] = y.astype(o_ref.dtype)


def _mixdown_kernel(cin, x_ref, w_ref, t_ref, s2_ref, t2_ref, a1_ref, a2_ref,
                    oc_ref, op_ref):
    """Fused ENet mix-down: conv branch (matmul+folded bias/BN) and 2x2 max-pool branch
    (taken from the im2col taps), each followed by per-channel PReLU."""
    x = x_ref[...]                                            # (TM, 9*cin) bf16
    # conv branch
    y1 = jnp.dot(x, w_ref[...], preferred_element_type=jnp.float32) + t_ref[...]
    y1 = jnp.where(y1 >= 0.0, y1, y1 * a1_ref[...])
    oc_ref[...] = y1.astype(oc_ref.dtype)
    # pool branch: the 3x3/s2/p1 patch taps (1,1),(1,2),(2,1),(2,2) are exactly the
    # 2x2 max-pool window of the (un-padded) input.
    p = x[:, 4 * cin:5 * cin].astype(jnp.float32)
    p = jnp.maximum(p, x[:, 5 * cin:6 * cin].astype(jnp.float32))
    p = jnp.maximum(p, x[:, 7 * cin:8 * cin].astype(jnp.float32))
    p = jnp.maximum(p, x[:, 8 * cin:9 * cin].astype(jnp.float32))
    y2 = p * s2_ref[...] + t2_ref[...]
    y2 = jnp.where(y2 >= 0.0, y2, y2 * a2_ref[...])
    op_ref[...] = y2.astype(op_ref.dtype)


# ----------------------------------------------------------------------------------
# Pallas wrappers
# ----------------------------------------------------------------------------------
def _matmul_fused(x, w, shift, addends=(), act="none", out_dtype=jnp.bfloat16):
    # x: (M, K)  w: (K, C)  shift: (C,)  addends: list of (M, C)
    M, K = x.shape
    C = w.shape[1]
    TM, Mp = _choose_tm(M)
    xb = jnp.asarray(x, jnp.bfloat16)
    adds = [jnp.asarray(a, jnp.bfloat16) for a in addends]
    if Mp != M:
        xb = jnp.pad(xb, ((0, Mp - M), (0, 0)))
        adds = [jnp.pad(a, ((0, Mp - M), (0, 0))) for a in adds]
    n_add = len(adds)
    in_specs = ([pl.BlockSpec((TM, K), lambda i: (i, 0)),
                 pl.BlockSpec((K, C), lambda i: (0, 0)),
                 pl.BlockSpec((1, C), lambda i: (0, 0))]
                + [pl.BlockSpec((TM, C), lambda i: (i, 0)) for _ in range(n_add)])
    out = pl.pallas_call(
        partial(_mm_kernel, act, n_add),
        out_shape=jax.ShapeDtypeStruct((Mp, C), out_dtype),
        grid=(Mp // TM,),
        in_specs=in_specs,
        out_specs=pl.BlockSpec((TM, C), lambda i: (i, 0)),
        compiler_params=_PARALLEL,
    )(xb, jnp.asarray(w, jnp.bfloat16),
      jnp.asarray(shift, jnp.float32).reshape(1, C), *adds)
    return out[:M] if Mp != M else out


def _mixdown_call(patches, w, t_conv, s_pool, t_pool, a_conv, a_pool, cin):
    M, K = patches.shape
    cconv = w.shape[1]
    TM, Mp = _choose_tm(M)
    xb = jnp.asarray(patches, jnp.bfloat16)
    if Mp != M:
        xb = jnp.pad(xb, ((0, Mp - M), (0, 0)))
    row = lambda v, n: jnp.asarray(v, jnp.float32).reshape(1, n)
    yc, yp = pl.pallas_call(
        partial(_mixdown_kernel, cin),
        out_shape=(jax.ShapeDtypeStruct((Mp, cconv), jnp.bfloat16),
                   jax.ShapeDtypeStruct((Mp, cin), jnp.bfloat16)),
        grid=(Mp // TM,),
        in_specs=[pl.BlockSpec((TM, K), lambda i: (i, 0)),
                  pl.BlockSpec((K, cconv), lambda i: (0, 0)),
                  pl.BlockSpec((1, cconv), lambda i: (0, 0)),
                  pl.BlockSpec((1, cin), lambda i: (0, 0)),
                  pl.BlockSpec((1, cin), lambda i: (0, 0)),
                  pl.BlockSpec((1, cconv), lambda i: (0, 0)),
                  pl.BlockSpec((1, cin), lambda i: (0, 0))],
        out_specs=[pl.BlockSpec((TM, cconv), lambda i: (i, 0)),
                   pl.BlockSpec((TM, cin), lambda i: (i, 0))],
        compiler_params=_PARALLEL,
    )(xb, jnp.asarray(w, jnp.bfloat16), row(t_conv, cconv), row(s_pool, cin),
      row(t_pool, cin), row(a_conv, cconv), row(a_pool, cin))
    if Mp != M:
        yc, yp = yc[:M], yp[:M]
    return yc, yp


# ----------------------------------------------------------------------------------
# im2col glue + conv wrappers
# ----------------------------------------------------------------------------------
def _im2col(x, kh, kw, stride, dilation, padding):
    sh, sw = stride
    dh, dw = dilation
    xp = jnp.pad(x, ((0, 0), padding[0], padding[1], (0, 0)))
    N, Hp, Wp, C = xp.shape
    Ho = (Hp - dh * (kh - 1) - 1) // sh + 1
    Wo = (Wp - dw * (kw - 1) - 1) // sw + 1
    cols = []
    for i in range(kh):
        for j in range(kw):
            sl = xp[:, i * dh: i * dh + sh * (Ho - 1) + 1: sh,
                       j * dw: j * dw + sw * (Wo - 1) + 1: sw, :]
            cols.append(sl)
    patches = jnp.concatenate(cols, axis=-1).reshape(N * Ho * Wo, kh * kw * C)
    return patches, (N, Ho, Wo)


def conv2d_fused(x, w, b, stride=(1, 1), dilation=(1, 1), padding=((0, 0), (0, 0)),
                 scale=None, shift=None, act="none", addends=(), out_dtype=jnp.bfloat16):
    # w layout: (KH, KW, Cin, Cout); bias + BN folded into (w', shift').
    KH, KW, Cin, Cout = w.shape
    w32 = jnp.asarray(w, jnp.float32)
    b32 = jnp.asarray(b, jnp.float32)
    if scale is None:
        w_f = w32.reshape(KH * KW * Cin, Cout)
        t = b32
    else:
        scale = jnp.asarray(scale, jnp.float32)
        shift = jnp.asarray(shift, jnp.float32)
        w_f = (w32 * scale[None, None, None, :]).reshape(KH * KW * Cin, Cout)
        t = b32 * scale + shift
    patches, (N, Ho, Wo) = _im2col(x, KH, KW, stride, dilation, padding)
    flat_add = [jnp.asarray(a, jnp.bfloat16).reshape(-1, Cout) for a in addends]
    out = _matmul_fused(patches, w_f, t, addends=flat_add, act=act, out_dtype=out_dtype)
    return out.reshape(N, Ho, Wo, Cout)


def _pixel_shuffle2(y, N, H, W, Cout):
    # y: (N*H*W, 4*Cout) with column block (a*2+b) -> output pixel (2i+a, 2j+b)
    y = y.reshape(N, H, W, 2, 2, Cout)
    y = y.transpose(0, 1, 3, 2, 4, 5)
    return y.reshape(N, 2 * H, 2 * W, Cout)


def deconv3x3_fused(x, wt, b, scale, shift):
    """ConvTranspose2d(k=3, s=2, p=1, op=1) + BN + ReLU via sub-pixel decomposition:
    one (M, 4*Cin) @ (4*Cin, 4*Cout) matmul followed by a pixel shuffle."""
    Cin, Cout = wt.shape[0], wt.shape[1]
    N, H, W, _ = x.shape
    wt32 = jnp.asarray(wt, jnp.float32)
    Wm = jnp.zeros((4, Cin, 4, Cout), jnp.float32)
    # tap t = di*2+dj holds x[i+di, j+dj]; phase p = a*2+b writes out[2i+a, 2j+b]
    taps = {0: [(0, (1, 1))],
            1: [(0, (1, 2)), (1, (1, 0))],
            2: [(0, (2, 1)), (2, (0, 1))],
            3: [(0, (2, 2)), (1, (2, 0)), (2, (0, 2)), (3, (0, 0))]}
    for phase, lst in taps.items():
        for tap, (ki, kj) in lst:
            Wm = Wm.at[tap, :, phase, :].set(wt32[:, :, ki, kj])
    Wm = Wm.reshape(4 * Cin, 4 * Cout)
    scale4 = jnp.tile(jnp.asarray(scale, jnp.float32), 4)
    shift4 = jnp.tile(jnp.asarray(shift, jnp.float32), 4)
    b4 = jnp.tile(jnp.asarray(b, jnp.float32), 4)
    Wm = Wm * scale4[None, :]
    t = b4 * scale4 + shift4
    patches, _ = _im2col(x, 2, 2, (1, 1), (1, 1), ((0, 1), (0, 1)))
    y = _matmul_fused(patches, Wm, t, act="relu", out_dtype=jnp.bfloat16)
    return _pixel_shuffle2(y, N, H, W, Cout)


def head_fused(x, wt, b):
    """ConvTranspose2d(k=2, s=2, p=0): out[2i+a, 2j+b] = x[i,j] @ W[:, :, a, b] + bias,
    packed as a single (M, Cin) @ (Cin, 4*Cout) matmul + pixel shuffle."""
    Cin, Cout = wt.shape[0], wt.shape[1]
    N, H, W, _ = x.shape
    Wm = jnp.transpose(jnp.asarray(wt, jnp.float32), (0, 2, 3, 1)).reshape(Cin, 4 * Cout)
    t = jnp.tile(jnp.asarray(b, jnp.float32), 4)
    y = _matmul_fused(x.reshape(-1, Cin), Wm, t, act="none", out_dtype=jnp.float32)
    return _pixel_shuffle2(y, N, H, W, Cout)


# ----------------------------------------------------------------------------------
# ESNet blocks
# ----------------------------------------------------------------------------------
def asym_conv_block(x, p, rw_act, addends=()):
    pad = p["padding"]
    d = p["dilation"]
    # left-wise (k,1) conv + bias + ReLU (no norm)
    y = conv2d_fused(x, p["lw_w"], p["lw_b"], dilation=(d, 1),
                     padding=((pad, pad), (0, 0)), act="relu")
    # right-wise (1,k) conv + bias + BN + (ReLU or none) [+ fused residual addends]
    y = conv2d_fused(y, p["rw_w"], p["rw_b"], dilation=(1, d),
                     padding=((0, 0), (pad, pad)),
                     scale=p["rw_scale"], shift=p["rw_shift"],
                     act=rw_act, addends=addends)
    return y


def fcu(x, p):
    # out = relu(conv2(conv1(x)) + x), residual add + relu fused into conv2's matmul.
    y = asym_conv_block(x, p["conv1"], "relu")
    y = asym_conv_block(y, p["conv2"], "relu", addends=(x,))
    return y  # dropout: identity in eval mode


def pfcu(x, p):
    # out = relu(b1 + b2 + b3 + x); the 3-way branch sum + identity + relu is fused
    # into the last branch's matmul epilogue.
    y = asym_conv_block(x, p["conv1"], "relu")
    b1 = asym_conv_block(y, p["branches"][0], "none")
    b2 = asym_conv_block(y, p["branches"][1], "none")
    out = asym_conv_block(y, p["branches"][2], "relu", addends=(b1, b2, x))
    return out


def enet_mix_down(x, p):
    cin = x.shape[-1]
    cconv = p["conv_w"].shape[-1]
    scale = jnp.asarray(p["bn_scale"], jnp.float32)
    shift = jnp.asarray(p["bn_shift"], jnp.float32)
    alpha = jnp.asarray(p["prelu_alpha"], jnp.float32)
    # fold conv bias + BN (conv-branch channels) into the weights
    w_f = (jnp.asarray(p["conv_w"], jnp.float32)
           * scale[:cconv][None, None, None, :]).reshape(9 * cin, cconv)
    t_c = jnp.asarray(p["conv_b"], jnp.float32) * scale[:cconv] + shift[:cconv]
    patches, (N, Ho, Wo) = _im2col(x, 3, 3, (2, 2), (1, 1), ((1, 1), (1, 1)))
    yc, yp = _mixdown_call(patches, w_f, t_c, scale[cconv:], shift[cconv:],
                           alpha[:cconv], alpha[cconv:], cin)
    out = jnp.concatenate([yc, yp], axis=-1)      # torch.cat((conv, pool), dim=1)
    return out.reshape(N, Ho, Wo, cconv + cin)


# ----------------------------------------------------------------------------------
# parameter init (deterministic, kaiming-uniform like the module's _init_params)
# ----------------------------------------------------------------------------------
def _kaiming_uniform(key, shape, fan_in):
    bound = math.sqrt(6.0 / fan_in)
    return jax.random.uniform(key, shape, jnp.float32, -bound, bound)


def _bn_affine(c, eps):
    gamma = jnp.ones((c,), jnp.float32)
    beta = jnp.zeros((c,), jnp.float32)
    mean = jnp.zeros((c,), jnp.float32)
    var = jnp.ones((c,), jnp.float32)
    scale = gamma / jnp.sqrt(var + eps)
    shift = beta - mean * scale
    return scale, shift


def _init_asym(key, c, k, padding, dilation, eps):
    k1, k2 = jax.random.split(key)
    scale, shift = _bn_affine(c, eps)
    return {
        "padding": padding, "dilation": dilation,
        "lw_w": _kaiming_uniform(k1, (k, 1, c, c), c * k),
        "lw_b": jnp.zeros((c,), jnp.float32),
        "rw_w": _kaiming_uniform(k2, (1, k, c, c), c * k),
        "rw_b": jnp.zeros((c,), jnp.float32),
        "rw_scale": scale, "rw_shift": shift,
    }


def init_esnet_params(key, layers, channels, kernel_sizes, in_channels,
                      num_classes, bn_eps=1e-5):
    keys = iter(jax.random.split(key, 256))
    params = {"encoder": [], "decoder": []}
    ic = in_channels
    n_enc = len(layers[0])
    for i, lps in enumerate(layers[0]):
        oc = channels[0][i]
        k = kernel_sizes[0][i]
        stage = []
        for j in range(lps):
            if j == 0:
                scale, shift = _bn_affine(oc, bn_eps)
                stage.append({
                    "type": "mixdown",
                    "conv_w": _kaiming_uniform(next(keys), (3, 3, ic, oc - ic), ic * 9),
                    "conv_b": jnp.zeros((oc - ic,), jnp.float32),
                    "bn_scale": scale, "bn_shift": shift,
                    "prelu_alpha": jnp.full((oc,), 0.25, jnp.float32),
                })
                ic = oc
            elif i != n_enc - 1:
                pad1 = (k - 1) // 2
                stage.append({
                    "type": "fcu",
                    "conv1": _init_asym(next(keys), ic, k, pad1, 1, bn_eps),
                    "conv2": _init_asym(next(keys), ic, k, pad1, 1, bn_eps),
                })
            else:
                pad1 = (k - 1) // 2
                stage.append({
                    "type": "pfcu",
                    "conv1": _init_asym(next(keys), ic, k, pad1, 1, bn_eps),
                    "branches": [_init_asym(next(keys), ic, k, d, d, bn_eps)
                                 for d in (2, 5, 9)],
                })
        params["encoder"].append(stage)

    for i, lps in enumerate(layers[1]):
        oc = channels[1][i]
        k = kernel_sizes[1][i]
        stage = []
        for j in range(lps):
            if j == 0:
                scale, shift = _bn_affine(oc, bn_eps)
                stage.append({
                    "type": "deconv",
                    "w": _kaiming_uniform(next(keys), (ic, oc, 3, 3), ic * 9),
                    "b": jnp.zeros((oc,), jnp.float32),
                    "bn_scale": scale, "bn_shift": shift,
                })
                ic = oc
            else:
                pad1 = (k - 1) // 2
                stage.append({
                    "type": "fcu",
                    "conv1": _init_asym(next(keys), ic, k, pad1, 1, bn_eps),
                    "conv2": _init_asym(next(keys), ic, k, pad1, 1, bn_eps),
                })
        params["decoder"].append(stage)

    params["head"] = {
        "w": _kaiming_uniform(next(keys), (ic, num_classes, 2, 2), ic * 4),
        "b": jnp.zeros((num_classes,), jnp.float32),
    }
    return params


# ----------------------------------------------------------------------------------
# full forward
# ----------------------------------------------------------------------------------
def esnet_forward(params, x_nchw):
    x = jnp.transpose(x_nchw, (0, 2, 3, 1)).astype(jnp.bfloat16)  # NCHW -> NHWC, bf16
    for stage in params["encoder"]:
        for u in stage:
            if u["type"] == "mixdown":
                x = enet_mix_down(x, u)
            elif u["type"] == "fcu":
                x = fcu(x, u)
            else:
                x = pfcu(x, u)
    for stage in params["decoder"]:
        for u in stage:
            if u["type"] == "deconv":
                x = deconv3x3_fused(x, u["w"], u["b"], u["bn_scale"], u["bn_shift"])
            else:
                x = fcu(x, u)
    x = head_fused(x, params["head"]["w"], params["head"]["b"])  # f32 output
    return jnp.transpose(x, (0, 3, 1, 2))  # NHWC -> NCHW


# ----------------------------------------------------------------------------------
if __name__ == "__main__":
    # Small ESNet configuration:
    #   encoder: stage1 = MixDown + FCU, stage2 (last) = MixDown + PFCU
    #   decoder: stage1 = deconv3x3 + FCU; head = ConvTranspose2d(k=2, s=2)
    layers = [[2, 2], [2]]
    channels = [[8, 16], [8]]
    kernel_sizes = [[3, 3], [3]]
    # dropout_rates = [[0.03, 0.3], [0.0]]  # dropout is identity in eval mode
    in_channels = 3
    num_classes = 4
    in_size = (16, 16)  # must be divisible by 8
    batch = 2

    key = jax.random.PRNGKey(0)
    kp, kx = jax.random.split(key)
    params = init_esnet_params(kp, layers, channels, kernel_sizes,
                               in_channels, num_classes)
    x = jax.random.normal(kx, (batch, in_channels, in_size[0], in_size[1]), jnp.float32)

    fwd = jax.jit(lambda inp: esnet_forward(params, inp))
    y = fwd(x)
    jax.block_until_ready(y)
    assert y.shape == (batch, num_classes, in_size[0], in_size[1]), y.shape
    assert jnp.all(jnp.isfinite(y))
    print("KERNEL_OK")
</pallas_src>

<mosaic_0001>
module attributes {stable_mosaic.version = 11 : i64} {
  func.func @_mixdown_kernel(%arg0: i32, %arg1: memref<128x27xbf16, #tpu.memory_space<vmem>>, %arg2: memref<27x5xbf16, #tpu.memory_space<vmem>>, %arg3: memref<1x5xf32, #tpu.memory_space<vmem>>, %arg4: memref<1x3xf32, #tpu.memory_space<vmem>>, %arg5: memref<1x3xf32, #tpu.memory_space<vmem>>, %arg6: memref<1x5xf32, #tpu.memory_space<vmem>>, %arg7: memref<1x3xf32, #tpu.memory_space<vmem>>, %arg8: memref<128x5xbf16, #tpu.memory_space<vmem>>, %arg9: memref<128x3xbf16, #tpu.memory_space<vmem>>) attributes {dimension_semantics = [#tpu.dimension_semantics<parallel>], iteration_bounds = array<i64: 1>, scalar_prefetch = 0 : i64, scratch_operands = 0 : i64, tpu.core_type = #tpu.core_type<tc>, window_params = [{transform_indices = @transform_0, window_bounds = array<i64: 128, 27>}, {pipeline_mode = #tpu.pipeline_mode<synchronous>, transform_indices = @transform_1, window_bounds = array<i64: 27, 5>}, {pipeline_mode = #tpu.pipeline_mode<synchronous>, transform_indices = @transform_2, window_bounds = array<i64: 1, 5>}, {pipeline_mode = #tpu.pipeline_mode<synchronous>, transform_indices = @transform_3, window_bounds = array<i64: 1, 3>}, {pipeline_mode = #tpu.pipeline_mode<synchronous>, transform_indices = @transform_4, window_bounds = array<i64: 1, 3>}, {pipeline_mode = #tpu.pipeline_mode<synchronous>, transform_indices = @transform_5, window_bounds = array<i64: 1, 5>}, {pipeline_mode = #tpu.pipeline_mode<synchronous>, transform_indices = @transform_6, window_bounds = array<i64: 1, 3>}, {transform_indices = @transform_7, window_bounds = array<i64: 128, 5>}, {transform_indices = @transform_8, window_bounds = array<i64: 128, 3>}]} {
    %c0 = arith.constant 0 : index
    %c0_0 = arith.constant 0 : index
    %0 = vector.load %arg1[%c0, %c0_0] : memref<128x27xbf16, #tpu.memory_space<vmem>>, vector<128x27xbf16>
    %c0_1 = arith.constant 0 : index
    %c0_2 = arith.constant 0 : index
    %1 = vector.load %arg2[%c0_1, %c0_2] : memref<27x5xbf16, #tpu.memory_space<vmem>>, vector<27x5xbf16>
    %cst = arith.constant dense<0.000000e+00> : vector<128x5xf32>
    %2 = tpu.matmul %0, %1, %cst {dimension_numbers = #tpu.dot_dimension_numbers<[1], [0], [0], [1], [0, 0, 1, 1], [], []>} : vector<128x27xbf16>, vector<27x5xbf16>, vector<128x5xf32> -> vector<128x5xf32>
    %c0_3 = arith.constant 0 : index
    %c0_4 = arith.constant 0 : index
    %3 = vector.load %arg3[%c0_3, %c0_4] : memref<1x5xf32, #tpu.memory_space<vmem>>, vector<1x5xf32>
    %4 = vector.broadcast %3 : vector<1x5xf32> to vector<128x5xf32>
    %5 = arith.addf %2, %4 : vector<128x5xf32>
    %cst_5 = arith.constant 0.000000e+00 : f32
    %6 = vector.broadcast %cst_5 : f32 to vector<128x5xf32>
    %7 = arith.cmpf oge, %5, %6 : vector<128x5xf32>
    %c0_6 = arith.constant 0 : index
    %c0_7 = arith.constant 0 : index
    %8 = vector.load %arg6[%c0_6, %c0_7] : memref<1x5xf32, #tpu.memory_space<vmem>>, vector<1x5xf32>
    %9 = vector.broadcast %8 : vector<1x5xf32> to vector<128x5xf32>
    %10 = arith.mulf %5, %9 : vector<128x5xf32>
    %11 = arith.select %7, %5, %10 : vector<128x5xi1>, vector<128x5xf32>
    %12 = arith.truncf %11 : vector<128x5xf32> to vector<128x5xbf16>
    %c0_8 = arith.constant 0 : index
    %c0_9 = arith.constant 0 : index
    %13 = vector.load %arg8[%c0_8, %c0_9] : memref<128x5xbf16, #tpu.memory_space<vmem>>, vector<128x5xbf16>
    tpu.vector_store %arg8[%c0_8, %c0_9], %12 {strides = array<i32>} : memref<128x5xbf16, #tpu.memory_space<vmem>>, vector<128x5xbf16>,
    %14 = vector.extract_strided_slice %0 {offsets = [0, 12], sizes = [128, 3], strides = [1, 1]} : vector<128x27xbf16> to vector<128x3xbf16>
    %15 = arith.extf %14 : vector<128x3xbf16> to vector<128x3xf32>
    %16 = vector.extract_strided_slice %0 {offsets = [0, 15], sizes = [128, 3], strides = [1, 1]} : vector<128x27xbf16> to vector<128x3xbf16>
    %17 = arith.extf %16 : vector<128x3xbf16> to vector<128x3xf32>
    %18 = arith.maximumf %15, %17 : vector<128x3xf32>
    %19 = vector.extract_strided_slice %0 {offsets = [0, 21], sizes = [128, 3], strides = [1, 1]} : vector<128x27xbf16> to vector<128x3xbf16>
    %20 = arith.extf %19 : vector<128x3xbf16> to vector<128x3xf32>
    %21 = arith.maximumf %18, %20 : vector<128x3xf32>
    %22 = vector.extract_strided_slice %0 {offsets = [0, 24], sizes = [128, 3], strides = [1, 1]} : vector<128x27xbf16> to vector<128x3xbf16>
    %23 = arith.extf %22 : vector<128x3xbf16> to vector<128x3xf32>
    %24 = arith.maximumf %21, %23 : vector<128x3xf32>
    %c0_10 = arith.constant 0 : index
    %c0_11 = arith.constant 0 : index
    %25 = vector.load %arg4[%c0_10, %c0_11] : memref<1x3xf32, #tpu.memory_space<vmem>>, vector<1x3xf32>
    %26 = vector.broadcast %25 : vector<1x3xf32> to vector<128x3xf32>
    %27 = arith.mulf %24, %26 : vector<128x3xf32>
    %c0_12 = arith.constant 0 : index
    %c0_13 = arith.constant 0 : index
    %28 = vector.load %arg5[%c0_12, %c0_13] : memref<1x3xf32, #tpu.memory_space<vmem>>, vector<1x3xf32>
    %29 = vector.broadcast %28 : vector<1x3xf32> to vector<128x3xf32>
    %30 = arith.addf %27, %29 : vector<128x3xf32>
    %cst_14 = arith.constant 0.000000e+00 : f32
    %31 = vector.broadcast %cst_14 : f32 to vector<128x3xf32>
    %32 = arith.cmpf oge, %30, %31 : vector<128x3xf32>
    %c0_15 = arith.constant 0 : index
    %c0_16 = arith.constant 0 : index
    %33 = vector.load %arg7[%c0_15, %c0_16] : memref<1x3xf32, #tpu.memory_space<vmem>>, vector<1x3xf32>
    %34 = vector.broadcast %33 : vector<1x3xf32> to vector<128x3xf32>
    %35 = arith.mulf %30, %34 : vector<128x3xf32>
    %36 = arith.select %32, %30, %35 : vector<128x3xi1>, vector<128x3xf32>
    %37 = arith.truncf %36 : vector<128x3xf32> to vector<128x3xbf16>
    %c0_17 = arith.constant 0 : index
    %c0_18 = arith.constant 0 : index
    %38 = vector.load %arg9[%c0_17, %c0_18] : memref<128x3xbf16, #tpu.memory_space<vmem>>, vector<128x3xbf16>
    tpu.vector_store %arg9[%c0_17, %c0_18], %37 {strides = array<i32>} : memref<128x3xbf16, #tpu.memory_space<vmem>>, vector<128x3xbf16>,
    return
  }
  func.func @transform_0(%arg0: i32) -> (i32, i32) {
    %c0_i32 = arith.constant 0 : i32
    %c0_i32_0 = arith.constant 0 : i32
    return %arg0, %c0_i32 : i32, i32
  }
  func.func @transform_1(%arg0: i32) -> (i32, i32) {
    %c0_i32 = arith.constant 0 : i32
    %c0_i32_0 = arith.constant 0 : i32
    %c0_i32_1 = arith.constant 0 : i32
    return %c0_i32, %c0_i32_0 : i32, i32
  }
  func.func @transform_2(%arg0: i32) -> (i32, i32) {
    %c0_i32 = arith.constant 0 : i32
    %c0_i32_0 = arith.constant 0 : i32
    %c0_i32_1 = arith.constant 0 : i32
    return %c0_i32, %c0_i32_0 : i32, i32
  }
  func.func @transform_3(%arg0: i32) -> (i32, i32) {
    %c0_i32 = arith.constant 0 : i32
    %c0_i32_0 = arith.constant 0 : i32
    %c0_i32_1 = arith.constant 0 : i32
    return %c0_i32, %c0_i32_0 : i32, i32
  }
  func.func @transform_4(%arg0: i32) -> (i32, i32) {
    %c0_i32 = arith.constant 0 : i32
    %c0_i32_0 = arith.constant 0 : i32
    %c0_i32_1 = arith.constant 0 : i32
    return %c0_i32, %c0_i32_0 : i32, i32
  }
  func.func @transform_5(%arg0: i32) -> (i32, i32) {
    %c0_i32 = arith.constant 0 : i32
    %c0_i32_0 = arith.constant 0 : i32
    %c0_i32_1 = arith.constant 0 : i32
    return %c0_i32, %c0_i32_0 : i32, i32
  }
  func.func @transform_6(%arg0: i32) -> (i32, i32) {
    %c0_i32 = arith.constant 0 : i32
    %c0_i32_0 = arith.constant 0 : i32
    %c0_i32_1 = arith.constant 0 : i32
    return %c0_i32, %c0_i32_0 : i32, i32
  }
  func.func @transform_7(%arg0: i32) -> (i32, i32) {
    %c0_i32 = arith.constant 0 : i32
    %c0_i32_0 = arith.constant 0 : i32
    return %arg0, %c0_i32 : i32, i32
  }
  func.func @transform_8(%arg0: i32) -> (i32, i32) {
    %c0_i32 = arith.constant 0 : i32
    %c0_i32_0 = arith.constant 0 : i32
    return %arg0, %c0_i32 : i32, i32
  }
}

module attributes {stable_mosaic.version = 11 : i64} {
  func.func @_mm_kernel(%arg0: i32, %arg1: memref<128x24xbf16, #tpu.memory_space<vmem>>, %arg2: memref<24x8xbf16, #tpu.memory_space<vmem>>, %arg3: memref<1x8xf32, #tpu.memory_space<vmem>>, %arg4: memref<128x8xbf16, #tpu.memory_space<vmem>>) attributes {dimension_semantics = [#tpu.dimension_semantics<parallel>], iteration_bounds = array<i64: 1>, scalar_prefetch = 0 : i64, scratch_operands = 0 : i64, tpu.core_type = #tpu.core_type<tc>, window_params = [{transform_indices = @transform_0, window_bounds = array<i64: 128, 24>}, {pipeline_mode = #tpu.pipeline_mode<synchronous>, transform_indices = @transform_1, window_bounds = array<i64: 24, 8>}, {pipeline_mode = #tpu.pipeline_mode<synchronous>, transform_indices = @transform_2, window_bounds = array<i64: 1, 8>}, {transform_indices = @transform_3, window_bounds = array<i64: 128, 8>}]} {
    %c0 = arith.constant 0 : index
    %c0_0 = arith.constant 0 : index
    %0 = vector.load %arg1[%c0, %c0_0] : memref<128x24xbf16, #tpu.memory_space<vmem>>, vector<128x24xbf16>
    %c0_1 = arith.constant 0 : index
    %c0_2 = arith.constant 0 : index
    %1 = vector.load %arg2[%c0_1, %c0_2] : memref<24x8xbf16, #tpu.memory_space<vmem>>, vector<24x8xbf16>
    %cst = arith.constant dense<0.000000e+00> : vector<128x8xf32>
    %2 = tpu.matmul %0, %1, %cst {dimension_numbers = #tpu.dot_dimension_numbers<[1], [0], [0], [1], [0, 0, 1, 1], [], []>} : vector<128x24xbf16>, vector<24x8xbf16>, vector<128x8xf32> -> vector<128x8xf32>
    %c0_3 = arith.constant 0 : index
    %c0_4 = arith.constant 0 : index
    %3 = vector.load %arg3[%c0_3, %c0_4] : memref<1x8xf32, #tpu.memory_space<vmem>>, vector<1x8xf32>
    %4 = vector.broadcast %3 : vector<1x8xf32> to vector<128x8xf32>
    %5 = arith.addf %2, %4 : vector<128x8xf32>
    %cst_5 = arith.constant 0.000000e+00 : f32
    %6 = vector.broadcast %cst_5 : f32 to vector<128x8xf32>
    %7 = arith.maximumf %5, %6 : vector<128x8xf32>
    %8 = arith.truncf %7 : vector<128x8xf32> to vector<128x8xbf16>
    %c0_6 = arith.constant 0 : index
    %c0_7 = arith.constant 0 : index
    %9 = vector.load %arg4[%c0_6, %c0_7] : memref<128x8xbf16, #tpu.memory_space<vmem>>, vector<128x8xbf16>
    tpu.vector_store %arg4[%c0_6, %c0_7], %8 {strides = array<i32>} : memref<128x8xbf16, #tpu.memory_space<vmem>>, vector<128x8xbf16>,
    return
  }
  func.func @transform_0(%arg0: i32) -> (i32, i32) {
    %c0_i32 = arith.constant 0 : i32
    %c0_i32_0 = arith.constant 0 : i32
    return %arg0, %c0_i32 : i32, i32
  }
  func.func @transform_1(%arg0: i32) -> (i32, i32) {
    %c0_i32 = arith.constant 0 : i32
    %c0_i32_0 = arith.constant 0 : i32
    %c0_i32_1 = arith.constant 0 : i32
    return %c0_i32, %c0_i32_0 : i32, i32
  }
  func.func @transform_2(%arg0: i32) -> (i32, i32) {
    %c0_i32 = arith.constant 0 : i32
    %c0_i32_0 = arith.constant 0 : i32
    %c0_i32_1 = arith.constant 0 : i32
    return %c0_i32, %c0_i32_0 : i32, i32
  }
  func.func @transform_3(%arg0: i32) -> (i32, i32) {
    %c0_i32 = arith.constant 0 : i32
    %c0_i32_0 = arith.constant 0 : i32
    return %arg0, %c0_i32 : i32, i32
  }
}

module attributes {stable_mosaic.version = 11 : i64} {
  func.func @_mm_kernel(%arg0: i32, %arg1: memref<128x24xbf16, #tpu.memory_space<vmem>>, %arg2: memref<24x8xbf16, #tpu.memory_space<vmem>>, %arg3: memref<1x8xf32, #tpu.memory_space<vmem>>, %arg4: memref<128x8xbf16, #tpu.memory_space<vmem>>, %arg5: memref<128x8xbf16, #tpu.memory_space<vmem>>) attributes {dimension_semantics = [#tpu.dimension_semantics<parallel>], iteration_bounds = array<i64: 1>, scalar_prefetch = 0 : i64, scratch_operands = 0 : i64, tpu.core_type = #tpu.core_type<tc>, window_params = [{transform_indices = @transform_0, window_bounds = array<i64: 128, 24>}, {pipeline_mode = #tpu.pipeline_mode<synchronous>, transform_indices = @transform_1, window_bounds = array<i64: 24, 8>}, {pipeline_mode = #tpu.pipeline_mode<synchronous>, transform_indices = @transform_2, window_bounds = array<i64: 1, 8>}, {transform_indices = @transform_3, window_bounds = array<i64: 128, 8>}, {transform_indices = @transform_4, window_bounds = array<i64: 128, 8>}]} {
    %c0 = arith.constant 0 : index
    %c0_0 = arith.constant 0 : index
    %0 = vector.load %arg1[%c0, %c0_0] : memref<128x24xbf16, #tpu.memory_space<vmem>>, vector<128x24xbf16>
    %c0_1 = arith.constant 0 : index
    %c0_2 = arith.constant 0 : index
    %1 = vector.load %arg2[%c0_1, %c0_2] : memref<24x8xbf16, #tpu.memory_space<vmem>>, vector<24x8xbf16>
    %cst = arith.constant dense<0.000000e+00> : vector<128x8xf32>
    %2 = tpu.matmul %0, %1, %cst {dimension_numbers = #tpu.dot_dimension_numbers<[1], [0], [0], [1], [0, 0, 1, 1], [], []>} : vector<128x24xbf16>, vector<24x8xbf16>, vector<128x8xf32> -> vector<128x8xf32>
    %c0_3 = arith.constant 0 : index
    %c0_4 = arith.constant 0 : index
    %3 = vector.load %arg3[%c0_3, %c0_4] : memref<1x8xf32, #tpu.memory_space<vmem>>, vector<1x8xf32>
    %4 = vector.broadcast %3 : vector<1x8xf32> to vector<128x8xf32>
    %5 = arith.addf %2, %4 : vector<128x8xf32>
    %c0_5 = arith.constant 0 : index
    %c0_6 = arith.constant 0 : index
    %6 = vector.load %arg4[%c0_5, %c0_6] : memref<128x8xbf16, #tpu.memory_space<vmem>>, vector<128x8xbf16>
    %7 = arith.extf %6 : vector<128x8xbf16> to vector<128x8xf32>
    %8 = arith.addf %5, %7 : vector<128x8xf32>
    %cst_7 = arith.constant 0.000000e+00 : f32
    %9 = vector.broadcast %cst_7 : f32 to vector<128x8xf32>
    %10 = arith.maximumf %8, %9 : vector<128x8xf32>
    %11 = arith.truncf %10 : vector<128x8xf32> to vector<128x8xbf16>
    %c0_8 = arith.constant 0 : index
    %c0_9 = arith.constant 0 : index
    %12 = vector.load %arg5[%c0_8, %c0_9] : memref<128x8xbf16, #tpu.memory_space<vmem>>, vector<128x8xbf16>
    tpu.vector_store %arg5[%c0_8, %c0_9], %11 {strides = array<i32>} : memref<128x8xbf16, #tpu.memory_space<vmem>>, vector<128x8xbf16>,
    return
  }
  func.func @transform_0(%arg0: i32) -> (i32, i32) {
    %c0_i32 = arith.constant 0 : i32
    %c0_i32_0 = arith.constant 0 : i32
    return %arg0, %c0_i32 : i32, i32
  }
  func.func @transform_1(%arg0: i32) -> (i32, i32) {
    %c0_i32 = arith.constant 0 : i32
    %c0_i32_0 = arith.constant 0 : i32
    %c0_i32_1 = arith.constant 0 : i32
    return %c0_i32, %c0_i32_0 : i32, i32
  }
  func.func @transform_2(%arg0: i32) -> (i32, i32) {
    %c0_i32 = arith.constant 0 : i32
    %c0_i32_0 = arith.constant 0 : i32
    %c0_i32_1 = arith.constant 0 : i32
    return %c0_i32, %c0_i32_0 : i32, i32
  }
  func.func @transform_3(%arg0: i32) -> (i32, i32) {
    %c0_i32 = arith.constant 0 : i32
    %c0_i32_0 = arith.constant 0 : i32
    return %arg0, %c0_i32 : i32, i32
  }
  func.func @transform_4(%arg0: i32) -> (i32, i32) {
    %c0_i32 = arith.constant 0 : i32
    %c0_i32_0 = arith.constant 0 : i32
    return %arg0, %c0_i32 : i32, i32
  }
}

module attributes {stable_mosaic.version = 11 : i64} {
  func.func @_mixdown_kernel(%arg0: i32, %arg1: memref<32x72xbf16, #tpu.memory_space<vmem>>, %arg2: memref<72x8xbf16, #tpu.memory_space<vmem>>, %arg3: memref<1x8xf32, #tpu.memory_space<vmem>>, %arg4: memref<1x8xf32, #tpu.memory_space<vmem>>, %arg5: memref<1x8xf32, #tpu.memory_space<vmem>>, %arg6: memref<1x8xf32, #tpu.memory_space<vmem>>, %arg7: memref<1x8xf32, #tpu.memory_space<vmem>>, %arg8: memref<32x8xbf16, #tpu.memory_space<vmem>>, %arg9: memref<32x8xbf16, #tpu.memory_space<vmem>>) attributes {dimension_semantics = [#tpu.dimension_semantics<parallel>], iteration_bounds = array<i64: 1>, scalar_prefetch = 0 : i64, scratch_operands = 0 : i64, tpu.core_type = #tpu.core_type<tc>, window_params = [{transform_indices = @transform_0, window_bounds = array<i64: 32, 72>}, {pipeline_mode = #tpu.pipeline_mode<synchronous>, transform_indices = @transform_1, window_bounds = array<i64: 72, 8>}, {pipeline_mode = #tpu.pipeline_mode<synchronous>, transform_indices = @transform_2, window_bounds = array<i64: 1, 8>}, {pipeline_mode = #tpu.pipeline_mode<synchronous>, transform_indices = @transform_3, window_bounds = array<i64: 1, 8>}, {pipeline_mode = #tpu.pipeline_mode<synchronous>, transform_indices = @transform_4, window_bounds = array<i64: 1, 8>}, {pipeline_mode = #tpu.pipeline_mode<synchronous>, transform_indices = @transform_5, window_bounds = array<i64: 1, 8>}, {pipeline_mode = #tpu.pipeline_mode<synchronous>, transform_indices = @transform_6, window_bounds = array<i64: 1, 8>}, {transform_indices = @transform_7, window_bounds = array<i64: 32, 8>}, {transform_indices = @transform_8, window_bounds = array<i64: 32, 8>}]} {
    %c0 = arith.constant 0 : index
    %c0_0 = arith.constant 0 : index
    %0 = vector.load %arg1[%c0, %c0_0] : memref<32x72xbf16, #tpu.memory_space<vmem>>, vector<32x72xbf16>
    %c0_1 = arith.constant 0 : index
    %c0_2 = arith.constant 0 : index
    %1 = vector.load %arg2[%c0_1, %c0_2] : memref<72x8xbf16, #tpu.memory_space<vmem>>, vector<72x8xbf16>
    %cst = arith.constant dense<0.000000e+00> : vector<32x8xf32>
    %2 = tpu.matmul %0, %1, %cst {dimension_numbers = #tpu.dot_dimension_numbers<[1], [0], [0], [1], [0, 0, 1, 1], [], []>} : vector<32x72xbf16>, vector<72x8xbf16>, vector<32x8xf32> -> vector<32x8xf32>
    %c0_3 = arith.constant 0 : index
    %c0_4 = arith.constant 0 : index
    %3 = vector.load %arg3[%c0_3, %c0_4] : memref<1x8xf32, #tpu.memory_space<vmem>>, vector<1x8xf32>
    %4 = vector.broadcast %3 : vector<1x8xf32> to vector<32x8xf32>
    %5 = arith.addf %2, %4 : vector<32x8xf32>
    %cst_5 = arith.constant 0.000000e+00 : f32
    %6 = vector.broadcast %cst_5 : f32 to vector<32x8xf32>
    %7 = arith.cmpf oge, %5, %6 : vector<32x8xf32>
    %c0_6 = arith.constant 0 : index
    %c0_7 = arith.constant 0 : index
    %8 = vector.load %arg6[%c0_6, %c0_7] : memref<1x8xf32, #tpu.memory_space<vmem>>, vector<1x8xf32>
    %9 = vector.broadcast %8 : vector<1x8xf32> to vector<32x8xf32>
    %10 = arith.mulf %5, %9 : vector<32x8xf32>
    %11 = arith.select %7, %5, %10 : vector<32x8xi1>, vector<32x8xf32>
    %12 = arith.truncf %11 : vector<32x8xf32> to vector<32x8xbf16>
    %c0_8 = arith.constant 0 : index
    %c0_9 = arith.constant 0 : index
    %13 = vector.load %arg8[%c0_8, %c0_9] : memref<32x8xbf16, #tpu.memory_space<vmem>>, vector<32x8xbf16>
    tpu.vector_store %arg8[%c0_8, %c0_9], %12 {strides = array<i32>} : memref<32x8xbf16, #tpu.memory_space<vmem>>, vector<32x8xbf16>,
    %14 = vector.extract_strided_slice %0 {offsets = [0, 32], sizes = [32, 8], strides = [1, 1]} : vector<32x72xbf16> to vector<32x8xbf16>
    %15 = arith.extf %14 : vector<32x8xbf16> to vector<32x8xf32>
    %16 = vector.extract_strided_slice %0 {offsets = [0, 40], sizes = [32, 8], strides = [1, 1]} : vector<32x72xbf16> to vector<32x8xbf16>
    %17 = arith.extf %16 : vector<32x8xbf16> to vector<32x8xf32>
    %18 = arith.maximumf %15, %17 : vector<32x8xf32>
    %19 = vector.extract_strided_slice %0 {offsets = [0, 56], sizes = [32, 8], strides = [1, 1]} : vector<32x72xbf16> to vector<32x8xbf16>
    %20 = arith.extf %19 : vector<32x8xbf16> to vector<32x8xf32>
    %21 = arith.maximumf %18, %20 : vector<32x8xf32>
    %22 = vector.extract_strided_slice %0 {offsets = [0, 64], sizes = [32, 8], strides = [1, 1]} : vector<32x72xbf16> to vector<32x8xbf16>
    %23 = arith.extf %22 : vector<32x8xbf16> to vector<32x8xf32>
    %24 = arith.maximumf %21, %23 : vector<32x8xf32>
    %c0_10 = arith.constant 0 : index
    %c0_11 = arith.constant 0 : index
    %25 = vector.load %arg4[%c0_10, %c0_11] : memref<1x8xf32, #tpu.memory_space<vmem>>, vector<1x8xf32>
    %26 = vector.broadcast %25 : vector<1x8xf32> to vector<32x8xf32>
    %27 = arith.mulf %24, %26 : vector<32x8xf32>
    %c0_12 = arith.constant 0 : index
    %c0_13 = arith.constant 0 : index
    %28 = vector.load %arg5[%c0_12, %c0_13] : memref<1x8xf32, #tpu.memory_space<vmem>>, vector<1x8xf32>
    %29 = vector.broadcast %28 : vector<1x8xf32> to vector<32x8xf32>
    %30 = arith.addf %27, %29 : vector<32x8xf32>
    %cst_14 = arith.constant 0.000000e+00 : f32
    %31 = vector.broadcast %cst_14 : f32 to vector<32x8xf32>
    %32 = arith.cmpf oge, %30, %31 : vector<32x8xf32>
    %c0_15 = arith.constant 0 : index
    %c0_16 = arith.constant 0 : index
    %33 = vector.load %arg7[%c0_15, %c0_16] : memref<1x8xf32, #tpu.memory_space<vmem>>, vector<1x8xf32>
    %34 = vector.broadcast %33 : vector<1x8xf32> to vector<32x8xf32>
    %35 = arith.mulf %30, %34 : vector<32x8xf32>
    %36 = arith.select %32, %30, %35 : vector<32x8xi1>, vector<32x8xf32>
    %37 = arith.truncf %36 : vector<32x8xf32> to vector<32x8xbf16>
    %c0_17 = arith.constant 0 : index
    %c0_18 = arith.constant 0 : index
    %38 = vector.load %arg9[%c0_17, %c0_18] : memref<32x8xbf16, #tpu.memory_space<vmem>>, vector<32x8xbf16>
    tpu.vector_store %arg9[%c0_17, %c0_18], %37 {strides = array<i32>} : memref<32x8xbf16, #tpu.memory_space<vmem>>, vector<32x8xbf16>,
    return
  }
  func.func @transform_0(%arg0: i32) -> (i32, i32) {
    %c0_i32 = arith.constant 0 : i32
    %c0_i32_0 = arith.constant 0 : i32
    return %arg0, %c0_i32 : i32, i32
  }
  func.func @transform_1(%arg0: i32) -> (i32, i32) {
    %c0_i32 = arith.constant 0 : i32
    %c0_i32_0 = arith.constant 0 : i32
    %c0_i32_1 = arith.constant 0 : i32
    return %c0_i32, %c0_i32_0 : i32, i32
  }
  func.func @transform_2(%arg0: i32) -> (i32, i32) {
    %c0_i32 = arith.constant 0 : i32
    %c0_i32_0 = arith.constant 0 : i32
    %c0_i32_1 = arith.constant 0 : i32
    return %c0_i32, %c0_i32_0 : i32, i32
  }
  func.func @transform_3(%arg0: i32) -> (i32, i32) {
    %c0_i32 = arith.constant 0 : i32
    %c0_i32_0 = arith.constant 0 : i32
    %c0_i32_1 = arith.constant 0 : i32
    return %c0_i32, %c0_i32_0 : i32, i32
  }
  func.func @transform_4(%arg0: i32) -> (i32, i32) {
    %c0_i32 = arith.constant 0 : i32
    %c0_i32_0 = arith.constant 0 : i32
    %c0_i32_1 = arith.constant 0 : i32
    return %c0_i32, %c0_i32_0 : i32, i32
  }
  func.func @transform_5(%arg0: i32) -> (i32, i32) {
    %c0_i32 = arith.constant 0 : i32
    %c0_i32_0 = arith.constant 0 : i32
    %c0_i32_1 = arith.constant 0 : i32
    return %c0_i32, %c0_i32_0 : i32, i32
  }
  func.func @transform_6(%arg0: i32) -> (i32, i32) {
    %c0_i32 = arith.constant 0 : i32
    %c0_i32_0 = arith.constant 0 : i32
    %c0_i32_1 = arith.constant 0 : i32
    return %c0_i32, %c0_i32_0 : i32, i32
  }
  func.func @transform_7(%arg0: i32) -> (i32, i32) {
    %c0_i32 = arith.constant 0 : i32
    %c0_i32_0 = arith.constant 0 : i32
    return %arg0, %c0_i32 : i32, i32
  }
  func.func @transform_8(%arg0: i32) -> (i32, i32) {
    %c0_i32 = arith.constant 0 : i32
    %c0_i32_0 = arith.constant 0 : i32
    return %arg0, %c0_i32 : i32, i32
  }
}

module attributes {stable_mosaic.version = 11 : i64} {
  func.func @_mm_kernel(%arg0: i32, %arg1: memref<32x48xbf16, #tpu.memory_space<vmem>>, %arg2: memref<48x16xbf16, #tpu.memory_space<vmem>>, %arg3: memref<1x16xf32, #tpu.memory_space<vmem>>, %arg4: memref<32x16xbf16, #tpu.memory_space<vmem>>) attributes {dimension_semantics = [#tpu.dimension_semantics<parallel>], iteration_bounds = array<i64: 1>, scalar_prefetch = 0 : i64, scratch_operands = 0 : i64, tpu.core_type = #tpu.core_type<tc>, window_params = [{transform_indices = @transform_0, window_bounds = array<i64: 32, 48>}, {pipeline_mode = #tpu.pipeline_mode<synchronous>, transform_indices = @transform_1, window_bounds = array<i64: 48, 16>}, {pipeline_mode = #tpu.pipeline_mode<synchronous>, transform_indices = @transform_2, window_bounds = array<i64: 1, 16>}, {transform_indices = @transform_3, window_bounds = array<i64: 32, 16>}]} {
    %c0 = arith.constant 0 : index
    %c0_0 = arith.constant 0 : index
    %0 = vector.load %arg1[%c0, %c0_0] : memref<32x48xbf16, #tpu.memory_space<vmem>>, vector<32x48xbf16>
    %c0_1 = arith.constant 0 : index
    %c0_2 = arith.constant 0 : index
    %1 = vector.load %arg2[%c0_1, %c0_2] : memref<48x16xbf16, #tpu.memory_space<vmem>>, vector<48x16xbf16>
    %cst = arith.constant dense<0.000000e+00> : vector<32x16xf32>
    %2 = tpu.matmul %0, %1, %cst {dimension_numbers = #tpu.dot_dimension_numbers<[1], [0], [0], [1], [0, 0, 1, 1], [], []>} : vector<32x48xbf16>, vector<48x16xbf16>, vector<32x16xf32> -> vector<32x16xf32>
    %c0_3 = arith.constant 0 : index
    %c0_4 = arith.constant 0 : index
    %3 = vector.load %arg3[%c0_3, %c0_4] : memref<1x16xf32, #tpu.memory_space<vmem>>, vector<1x16xf32>
    %4 = vector.broadcast %3 : vector<1x16xf32> to vector<32x16xf32>
    %5 = arith.addf %2, %4 : vector<32x16xf32>
    %cst_5 = arith.constant 0.000000e+00 : f32
    %6 = vector.broadcast %cst_5 : f32 to vector<32x16xf32>
    %7 = arith.maximumf %5, %6 : vector<32x16xf32>
    %8 = arith.truncf %7 : vector<32x16xf32> to vector<32x16xbf16>
    %c0_6 = arith.constant 0 : index
    %c0_7 = arith.constant 0 : index
    %9 = vector.load %arg4[%c0_6, %c0_7] : memref<32x16xbf16, #tpu.memory_space<vmem>>, vector<32x16xbf16>
    tpu.vector_store %arg4[%c0_6, %c0_7], %8 {strides = array<i32>} : memref<32x16xbf16, #tpu.memory_space<vmem>>, vector<32x16xbf16>,
    return
  }
  func.func @transform_0(%arg0: i32) -> (i32, i32) {
    %c0_i32 = arith.constant 0 : i32
    %c0_i32_0 = arith.constant 0 : i32
    return %arg0, %c0_i32 : i32, i32
  }
  func.func @transform_1(%arg0: i32) -> (i32, i32) {
    %c0_i32 = arith.constant 0 : i32
    %c0_i32_0 = arith.constant 0 : i32
    %c0_i32_1 = arith.constant 0 : i32
    return %c0_i32, %c0_i32_0 : i32, i32
  }
  func.func @transform_2(%arg0: i32) -> (i32, i32) {
    %c0_i32 = arith.constant 0 : i32
    %c0_i32_0 = arith.constant 0 : i32
    %c0_i32_1 = arith.constant 0 : i32
    return %c0_i32, %c0_i32_0 : i32, i32
  }
  func.func @transform_3(%arg0: i32) -> (i32, i32) {
    %c0_i32 = arith.constant 0 : i32
    %c0_i32_0 = arith.constant 0 : i32
    return %arg0, %c0_i32 : i32, i32
  }
}

module attributes {stable_mosaic.version = 11 : i64} {
  func.func @_mm_kernel(%arg0: i32, %arg1: memref<32x48xbf16, #tpu.memory_space<vmem>>, %arg2: memref<48x16xbf16, #tpu.memory_space<vmem>>, %arg3: memref<1x16xf32, #tpu.memory_space<vmem>>, %arg4: memref<32x16xbf16, #tpu.memory_space<vmem>>) attributes {dimension_semantics = [#tpu.dimension_semantics<parallel>], iteration_bounds = array<i64: 1>, scalar_prefetch = 0 : i64, scratch_operands = 0 : i64, tpu.core_type = #tpu.core_type<tc>, window_params = [{transform_indices = @transform_0, window_bounds = array<i64: 32, 48>}, {pipeline_mode = #tpu.pipeline_mode<synchronous>, transform_indices = @transform_1, window_bounds = array<i64: 48, 16>}, {pipeline_mode = #tpu.pipeline_mode<synchronous>, transform_indices = @transform_2, window_bounds = array<i64: 1, 16>}, {transform_indices = @transform_3, window_bounds = array<i64: 32, 16>}]} {
    %c0 = arith.constant 0 : index
    %c0_0 = arith.constant 0 : index
    %0 = vector.load %arg1[%c0, %c0_0] : memref<32x48xbf16, #tpu.memory_space<vmem>>, vector<32x48xbf16>
    %c0_1 = arith.constant 0 : index
    %c0_2 = arith.constant 0 : index
    %1 = vector.load %arg2[%c0_1, %c0_2] : memref<48x16xbf16, #tpu.memory_space<vmem>>, vector<48x16xbf16>
    %cst = arith.constant dense<0.000000e+00> : vector<32x16xf32>
    %2 = tpu.matmul %0, %1, %cst {dimension_numbers = #tpu.dot_dimension_numbers<[1], [0], [0], [1], [0, 0, 1, 1], [], []>} : vector<32x48xbf16>, vector<48x16xbf16>, vector<32x16xf32> -> vector<32x16xf32>
    %c0_3 = arith.constant 0 : index
    %c0_4 = arith.constant 0 : index
    %3 = vector.load %arg3[%c0_3, %c0_4] : memref<1x16xf32, #tpu.memory_space<vmem>>, vector<1x16xf32>
    %4 = vector.broadcast %3 : vector<1x16xf32> to vector<32x16xf32>
    %5 = arith.addf %2, %4 : vector<32x16xf32>
    %6 = arith.truncf %5 : vector<32x16xf32> to vector<32x16xbf16>
    %c0_5 = arith.constant 0 : index
    %c0_6 = arith.constant 0 : index
    %7 = vector.load %arg4[%c0_5, %c0_6] : memref<32x16xbf16, #tpu.memory_space<vmem>>, vector<32x16xbf16>
    tpu.vector_store %arg4[%c0_5, %c0_6], %6 {strides = array<i32>} : memref<32x16xbf16, #tpu.memory_space<vmem>>, vector<32x16xbf16>,
    return
  }
  func.func @transform_0(%arg0: i32) -> (i32, i32) {
    %c0_i32 = arith.constant 0 : i32
    %c0_i32_0 = arith.constant 0 : i32
    return %arg0, %c0_i32 : i32, i32
  }
  func.func @transform_1(%arg0: i32) -> (i32, i32) {
    %c0_i32 = arith.constant 0 : i32
    %c0_i32_0 = arith.constant 0 : i32
    %c0_i32_1 = arith.constant 0 : i32
    return %c0_i32, %c0_i32_0 : i32, i32
  }
  func.func @transform_2(%arg0: i32) -> (i32, i32) {
    %c0_i32 = arith.constant 0 : i32
    %c0_i32_0 = arith.constant 0 : i32
    %c0_i32_1 = arith.constant 0 : i32
    return %c0_i32, %c0_i32_0 : i32, i32
  }
  func.func @transform_3(%arg0: i32) -> (i32, i32) {
    %c0_i32 = arith.constant 0 : i32
    %c0_i32_0 = arith.constant 0 : i32
    return %arg0, %c0_i32 : i32, i32
  }
}

module attributes {stable_mosaic.version = 11 : i64} {
  func.func @_mm_kernel(%arg0: i32, %arg1: memref<32x48xbf16, #tpu.memory_space<vmem>>, %arg2: memref<48x16xbf16, #tpu.memory_space<vmem>>, %arg3: memref<1x16xf32, #tpu.memory_space<vmem>>, %arg4: memref<32x16xbf16, #tpu.memory_space<vmem>>, %arg5: memref<32x16xbf16, #tpu.memory_space<vmem>>, %arg6: memref<32x16xbf16, #tpu.memory_space<vmem>>, %arg7: memref<32x16xbf16, #tpu.memory_space<vmem>>) attributes {dimension_semantics = [#tpu.dimension_semantics<parallel>], iteration_bounds = array<i64: 1>, scalar_prefetch = 0 : i64, scratch_operands = 0 : i64, tpu.core_type = #tpu.core_type<tc>, window_params = [{transform_indices = @transform_0, window_bounds = array<i64: 32, 48>}, {pipeline_mode = #tpu.pipeline_mode<synchronous>, transform_indices = @transform_1, window_bounds = array<i64: 48, 16>}, {pipeline_mode = #tpu.pipeline_mode<synchronous>, transform_indices = @transform_2, window_bounds = array<i64: 1, 16>}, {transform_indices = @transform_3, window_bounds = array<i64: 32, 16>}, {transform_indices = @transform_4, window_bounds = array<i64: 32, 16>}, {transform_indices = @transform_5, window_bounds = array<i64: 32, 16>}, {transform_indices = @transform_6, window_bounds = array<i64: 32, 16>}]} {
    %c0 = arith.constant 0 : index
    %c0_0 = arith.constant 0 : index
    %0 = vector.load %arg1[%c0, %c0_0] : memref<32x48xbf16, #tpu.memory_space<vmem>>, vector<32x48xbf16>
    %c0_1 = arith.constant 0 : index
    %c0_2 = arith.constant 0 : index
    %1 = vector.load %arg2[%c0_1, %c0_2] : memref<48x16xbf16, #tpu.memory_space<vmem>>, vector<48x16xbf16>
    %cst = arith.constant dense<0.000000e+00> : vector<32x16xf32>
    %2 = tpu.matmul %0, %1, %cst {dimension_numbers = #tpu.dot_dimension_numbers<[1], [0], [0], [1], [0, 0, 1, 1], [], []>} : vector<32x48xbf16>, vector<48x16xbf16>, vector<32x16xf32> -> vector<32x16xf32>
    %c0_3 = arith.constant 0 : index
    %c0_4 = arith.constant 0 : index
    %3 = vector.load %arg3[%c0_3, %c0_4] : memref<1x16xf32, #tpu.memory_space<vmem>>, vector<1x16xf32>
    %4 = vector.broadcast %3 : vector<1x16xf32> to vector<32x16xf32>
    %5 = arith.addf %2, %4 : vector<32x16xf32>
    %c0_5 = arith.constant 0 : index
    %c0_6 = arith.constant 0 : index
    %6 = vector.load %arg4[%c0_5, %c0_6] : memref<32x16xbf16, #tpu.memory_space<vmem>>, vector<32x16xbf16>
    %7 = arith.extf %6 : vector<32x16xbf16> to vector<32x16xf32>
    %8 = arith.addf %5, %7 : vector<32x16xf32>
    %c0_7 = arith.constant 0 : index
    %c0_8 = arith.constant 0 : index
    %9 = vector.load %arg5[%c0_7, %c0_8] : memref<32x16xbf16, #tpu.memory_space<vmem>>, vector<32x16xbf16>
    %10 = arith.extf %9 : vector<32x16xbf16> to vector<32x16xf32>
    %11 = arith.addf %8, %10 : vector<32x16xf32>
    %c0_9 = arith.constant 0 : index
    %c0_10 = arith.constant 0 : index
    %12 = vector.load %arg6[%c0_9, %c0_10] : memref<32x16xbf16, #tpu.memory_space<vmem>>, vector<32x16xbf16>
    %13 = arith.extf %12 : vector<32x16xbf16> to vector<32x16xf32>
    %14 = arith.addf %11, %13 : vector<32x16xf32>
    %cst_11 = arith.constant 0.000000e+00 : f32
    %15 = vector.broadcast %cst_11 : f32 to vector<32x16xf32>
    %16 = arith.maximumf %14, %15 : vector<32x16xf32>
    %17 = arith.truncf %16 : vector<32x16xf32> to vector<32x16xbf16>
    %c0_12 = arith.constant 0 : index
    %c0_13 = arith.constant 0 : index
    %18 = vector.load %arg7[%c0_12, %c0_13] : memref<32x16xbf16, #tpu.memory_space<vmem>>, vector<32x16xbf16>
    tpu.vector_store %arg7[%c0_12, %c0_13], %17 {strides = array<i32>} : memref<32x16xbf16, #tpu.memory_space<vmem>>, vector<32x16xbf16>,
    return
  }
  func.func @transform_0(%arg0: i32) -> (i32, i32) {
    %c0_i32 = arith.constant 0 : i32
    %c0_i32_0 = arith.constant 0 : i32
    return %arg0, %c0_i32 : i32, i32
  }
  func.func @transform_1(%arg0: i32) -> (i32, i32) {
    %c0_i32 = arith.constant 0 : i32
    %c0_i32_0 = arith.constant 0 : i32
    %c0_i32_1 = arith.constant 0 : i32
    return %c0_i32, %c0_i32_0 : i32, i32
  }
  func.func @transform_2(%arg0: i32) -> (i32, i32) {
    %c0_i32 = arith.constant 0 : i32
    %c0_i32_0 = arith.constant 0 : i32
    %c0_i32_1 = arith.constant 0 : i32
    return %c0_i32, %c0_i32_0 : i32, i32
  }
  func.func @transform_3(%arg0: i32) -> (i32, i32) {
    %c0_i32 = arith.constant 0 : i32
    %c0_i32_0 = arith.constant 0 : i32
    return %arg0, %c0_i32 : i32, i32
  }
  func.func @transform_4(%arg0: i32) -> (i32, i32) {
    %c0_i32 = arith.constant 0 : i32
    %c0_i32_0 = arith.constant 0 : i32
    return %arg0, %c0_i32 : i32, i32
  }
  func.func @transform_5(%arg0: i32) -> (i32, i32) {
    %c0_i32 = arith.constant 0 : i32
    %c0_i32_0 = arith.constant 0 : i32
    return %arg0, %c0_i32 : i32, i32
  }
  func.func @transform_6(%arg0: i32) -> (i32, i32) {
    %c0_i32 = arith.constant 0 : i32
    %c0_i32_0 = arith.constant 0 : i32
    return %arg0, %c0_i32 : i32, i32
  }
}

module attributes {stable_mosaic.version = 11 : i64} {
  func.func @_mm_kernel(%arg0: i32, %arg1: memref<32x64xbf16, #tpu.memory_space<vmem>>, %arg2: memref<64x32xbf16, #tpu.memory_space<vmem>>, %arg3: memref<1x32xf32, #tpu.memory_space<vmem>>, %arg4: memref<32x32xbf16, #tpu.memory_space<vmem>>) attributes {dimension_semantics = [#tpu.dimension_semantics<parallel>], iteration_bounds = array<i64: 1>, scalar_prefetch = 0 : i64, scratch_operands = 0 : i64, tpu.core_type = #tpu.core_type<tc>, window_params = [{transform_indices = @transform_0, window_bounds = array<i64: 32, 64>}, {pipeline_mode = #tpu.pipeline_mode<synchronous>, transform_indices = @transform_1, window_bounds = array<i64: 64, 32>}, {pipeline_mode = #tpu.pipeline_mode<synchronous>, transform_indices = @transform_2, window_bounds = array<i64: 1, 32>}, {transform_indices = @transform_3, window_bounds = array<i64: 32, 32>}]} {
    %c0 = arith.constant 0 : index
    %c0_0 = arith.constant 0 : index
    %0 = vector.load %arg1[%c0, %c0_0] : memref<32x64xbf16, #tpu.memory_space<vmem>>, vector<32x64xbf16>
    %c0_1 = arith.constant 0 : index
    %c0_2 = arith.constant 0 : index
    %1 = vector.load %arg2[%c0_1, %c0_2] : memref<64x32xbf16, #tpu.memory_space<vmem>>, vector<64x32xbf16>
    %cst = arith.constant dense<0.000000e+00> : vector<32x32xf32>
    %2 = tpu.matmul %0, %1, %cst {dimension_numbers = #tpu.dot_dimension_numbers<[1], [0], [0], [1], [0, 0, 1, 1], [], []>} : vector<32x64xbf16>, vector<64x32xbf16>, vector<32x32xf32> -> vector<32x32xf32>
    %c0_3 = arith.constant 0 : index
    %c0_4 = arith.constant 0 : index
    %3 = vector.load %arg3[%c0_3, %c0_4] : memref<1x32xf32, #tpu.memory_space<vmem>>, vector<1x32xf32>
    %4 = vector.broadcast %3 : vector<1x32xf32> to vector<32x32xf32>
    %5 = arith.addf %2, %4 : vector<32x32xf32>
    %cst_5 = arith.constant 0.000000e+00 : f32
    %6 = vector.broadcast %cst_5 : f32 to vector<32x32xf32>
    %7 = arith.maximumf %5, %6 : vector<32x32xf32>
    %8 = arith.truncf %7 : vector<32x32xf32> to vector<32x32xbf16>
    %c0_6 = arith.constant 0 : index
    %c0_7 = arith.constant 0 : index
    %9 = vector.load %arg4[%c0_6, %c0_7] : memref<32x32xbf16, #tpu.memory_space<vmem>>, vector<32x32xbf16>
    tpu.vector_store %arg4[%c0_6, %c0_7], %8 {strides = array<i32>} : memref<32x32xbf16, #tpu.memory_space<vmem>>, vector<32x32xbf16>,
    return
  }
  func.func @transform_0(%arg0: i32) -> (i32, i32) {
    %c0_i32 = arith.constant 0 : i32
    %c0_i32_0 = arith.constant 0 : i32
    return %arg0, %c0_i32 : i32, i32
  }
  func.func @transform_1(%arg0: i32) -> (i32, i32) {
    %c0_i32 = arith.constant 0 : i32
    %c0_i32_0 = arith.constant 0 : i32
    %c0_i32_1 = arith.constant 0 : i32
    return %c0_i32, %c0_i32_0 : i32, i32
  }
  func.func @transform_2(%arg0: i32) -> (i32, i32) {
    %c0_i32 = arith.constant 0 : i32
    %c0_i32_0 = arith.constant 0 : i32
    %c0_i32_1 = arith.constant 0 : i32
    return %c0_i32, %c0_i32_0 : i32, i32
  }
  func.func @transform_3(%arg0: i32) -> (i32, i32) {
    %c0_i32 = arith.constant 0 : i32
    %c0_i32_0 = arith.constant 0 : i32
    return %arg0, %c0_i32 : i32, i32
  }
}

module attributes {stable_mosaic.version = 11 : i64} {
  func.func @_mm_kernel(%arg0: i32, %arg1: memref<128x8xbf16, #tpu.memory_space<vmem>>, %arg2: memref<8x16xbf16, #tpu.memory_space<vmem>>, %arg3: memref<1x16xf32, #tpu.memory_space<vmem>>, %arg4: memref<128x16xf32, #tpu.memory_space<vmem>>) attributes {dimension_semantics = [#tpu.dimension_semantics<parallel>], iteration_bounds = array<i64: 1>, scalar_prefetch = 0 : i64, scratch_operands = 0 : i64, tpu.core_type = #tpu.core_type<tc>, window_params = [{transform_indices = @transform_0, window_bounds = array<i64: 128, 8>}, {pipeline_mode = #tpu.pipeline_mode<synchronous>, transform_indices = @transform_1, window_bounds = array<i64: 8, 16>}, {pipeline_mode = #tpu.pipeline_mode<synchronous>, transform_indices = @transform_2, window_bounds = array<i64: 1, 16>}, {transform_indices = @transform_3, window_bounds = array<i64: 128, 16>}]} {
    %c0 = arith.constant 0 : index
    %c0_0 = arith.constant 0 : index
    %0 = vector.load %arg1[%c0, %c0_0] : memref<128x8xbf16, #tpu.memory_space<vmem>>, vector<128x8xbf16>
    %c0_1 = arith.constant 0 : index
    %c0_2 = arith.constant 0 : index
    %1 = vector.load %arg2[%c0_1, %c0_2] : memref<8x16xbf16, #tpu.memory_space<vmem>>, vector<8x16xbf16>
    %cst = arith.constant dense<0.000000e+00> : vector<128x16xf32>
    %2 = tpu.matmul %0, %1, %cst {dimension_numbers = #tpu.dot_dimension_numbers<[1], [0], [0], [1], [0, 0, 1, 1], [], []>} : vector<128x8xbf16>, vector<8x16xbf16>, vector<128x16xf32> -> vector<128x16xf32>
    %c0_3 = arith.constant 0 : index
    %c0_4 = arith.constant 0 : index
    %3 = vector.load %arg3[%c0_3, %c0_4] : memref<1x16xf32, #tpu.memory_space<vmem>>, vector<1x16xf32>
    %4 = vector.broadcast %3 : vector<1x16xf32> to vector<128x16xf32>
    %5 = arith.addf %2, %4 : vector<128x16xf32>
    %c0_5 = arith.constant 0 : index
    %c0_6 = arith.constant 0 : index
    %6 = vector.load %arg4[%c0_5, %c0_6] : memref<128x16xf32, #tpu.memory_space<vmem>>, vector<128x16xf32>
    tpu.vector_store %arg4[%c0_5, %c0_6], %5 {strides = array<i32>} : memref<128x16xf32, #tpu.memory_space<vmem>>, vector<128x16xf32>,
    return
  }
  func.func @transform_0(%arg0: i32) -> (i32, i32) {
    %c0_i32 = arith.constant 0 : i32
    %c0_i32_0 = arith.constant 0 : i32
    return %arg0, %c0_i32 : i32, i32
  }
  func.func @transform_1(%arg0: i32) -> (i32, i32) {
    %c0_i32 = arith.constant 0 : i32
    %c0_i32_0 = arith.constant 0 : i32
    %c0_i32_1 = arith.constant 0 : i32
    return %c0_i32, %c0_i32_0 : i32, i32
  }
  func.func @transform_2(%arg0: i32) -> (i32, i32) {
    %c0_i32 = arith.constant 0 : i32
    %c0_i32_0 = arith.constant 0 : i32
    %c0_i32_1 = arith.constant 0 : i32
    return %c0_i32, %c0_i32_0 : i32, i32
  }
  func.func @transform_3(%arg0: i32) -> (i32, i32) {
    %c0_i32 = arith.constant 0 : i32
    %c0_i32_0 = arith.constant 0 : i32
    return %arg0, %c0_i32 : i32, i32
  }
}

</mosaic_0001>

<bundles_post_ra>
// kernel: _lambda_.20
= control target key start
LH: loop header
LB: loop body
LE: loop exit
PB: predicated region body
PF: predicated region fallthrough
CT: control target
= control target key end

     0   :  { %vm132_vm0 = vcmask 1044480   ;;  %s1088_s19 = smov 125   ;;  %vm133_vm1 = vcmask 1045504   ;;  %v1089_v25 = vmov 65535   ;;  %vm107_vm2 = vcmask 220160   ;;  %s1092_s30 = smov 12   ;;  %s1590_s0 = inlined_call_operand.vmem [shape: bf16[128,27], index: 0, kind: input, shape index: {}]   ;;  %s1591_s1 = inlined_call_operand.vmem [shape: bf16[27,5], index: 1, kind: input, shape index: {}]   ;;  %s1592_s3 = inlined_call_operand.vmem [shape: f32[1,3], index: 3, kind: input, shape index: {}]   ;;  %s1593_s4 = inlined_call_operand.vmem [shape: f32[1,3], index: 4, kind: input, shape index: {}]   ;;  %s1594_s6 = inlined_call_operand.vmem [shape: f32[1,3], index: 6, kind: input, shape index: {}]   ;;  %s1595_s2 = inlined_call_operand.vmem [shape: f32[1,5], index: 2, kind: input, shape index: {}]   ;;  %s1596_s5 = inlined_call_operand.vmem [shape: f32[1,5], index: 5, kind: input, shape index: {}]   ;;  %s1597_s7 = inlined_call_operand.vmem [shape: bf16[128,5], index: 7, kind: output, shape index: {0}]   ;;  %s1598_s8 = inlined_call_operand.vmem [shape: bf16[128,3], index: 8, kind: output, shape index: {1}]  }
   0x1   :  { %v1141_v0 = vld [vmem:[%s1590_s0 + $0x10] sm:$0xff]   ;;  %v1146_v1 = vld [vmem:[%s1590_s0] sm:$0xff]   ;;  %v1151_v2 = vld [vmem:[%s1590_s0 + $0x18] sm:$0xff]   ;;  %v134_v26 = vsel %vm132_vm0, 4294967295, %v1089_v25 }
   0x2   :  { %v376_v3 = vunpack.c.l.bf16 %v1141_v0  ;;  %v377_v4 = vunpack.c.h.bf16 %v1141_v0  ;;  %v372_v5 = vunpack.c.l.bf16 %v1146_v1  ;;  %v373_v6 = vunpack.c.h.bf16 %v1146_v1  ;;  %v1160_v7 = vld [vmem:[%s1590_s0 + $0x8] sm:$0xff]   ;;  %v1174_v13 = vld [vmem:[%s1590_s0 + $0x20] sm:$0xff]   ;;  %v1207_v23 = vld [vmem:[%s1590_s0 + $0x38] sm:$0xff]   ;;  %925 = vmatprep.mubr.msk.bf16.mxu0 %vm107_vm2, %v1146_v1 }
   0x3   :  { %v1165_v8 = vld [vmem:[%s1590_s0 + $0x28] sm:$0xff]   ;;  %v378_v9 = vunpack.c.l.bf16 %v1151_v2  ;;  %v379_v10 = vunpack.c.h.bf16 %v1151_v2  ;;  %v374_v11 = vunpack.c.l.bf16 %v1160_v7  ;;  %v375_v12 = vunpack.c.h.bf16 %v1160_v7  ;;  %v1070_v18 = vld [vmem:[%s1591_s1] sm:$0xff]   ;;  %v1212_v24 = vld [vmem:[%s1590_s0 + $0x30] sm:$0xff]   ;;  %933 = vmatprep.mubr.msk.bf16.mxu1 %vm107_vm2, %v1174_v13  ;;  %s1090_s0 = smov 119  }
   0x4   :  { %v1180_v14 = vpack.i.bf16 %v377_v4, %v376_v3  ;;  %v950_v15 = vpack.i.bf16 %v373_v6, %v372_v5  ;;  %v382_v16 = vunpack.c.l.bf16 %v1165_v8  ;;  %v383_v17 = vunpack.c.h.bf16 %v1165_v8  ;;  %921 = vmatprep.subr.bf16.mxu0 %v1070_v18  ;;  %941 = vmatprep.subr.bf16.mxu1 %v1070_v18  ;;  %v1071_v27 = vld [vmem:[%s1591_s1 + $0x8] sm:$0x3f]   ;;  %s1091_s1 = smov 116   ;;  %v860_v38 = vld [vmem:[%s1592_s3] ss:$0 sm:$0xff] }
   0x5   :  { %v965_v19 = vpack.i.bf16 %v379_v10, %v378_v9  ;;  %v955_v20 = vpack.i.bf16 %v375_v12, %v374_v11  ;;  %v380_v21 = vunpack.c.l.bf16 %v1174_v13  ;;  %v381_v22 = vunpack.c.h.bf16 %v1174_v13  ;;  %922 = vmatpush3.bf16.msra.mxu0 %v1070_v18  ;;  %943 = vmatpush3.bf16.msra.mxu1 %v1070_v18  ;;  %v861_v39 = vld [vmem:[%s1593_s4] ss:$0 sm:$0xff] }
   0x6   :  { %961 = vrot.lane.b32.xlu1 %v1180_v14, %s1088_s19  ;;  %951 = vrot.lane.b32.xlu0 %v950_v15, %s1088_s19  ;;  %v975_v28 = vpack.i.bf16 %v383_v17, %v382_v16  ;;  %v386_v29 = vunpack.c.l.bf16 %v1207_v23  ;;  %v387_v30 = vunpack.c.h.bf16 %v1207_v23  ;;  %v384_v32 = vunpack.c.l.bf16 %v1212_v24  ;;  %v862_v40 = vld [vmem:[%s1594_s6] ss:$0 sm:$0xff] }
   0x7   :  { %v970_v31 = vpack.i.bf16 %v381_v22, %v380_v21  ;;  %v385_v33 = vunpack.c.h.bf16 %v1212_v24  ;;  %v135_v34 = vsel %vm133_vm1, %v134_v26, 0 }
   0x8   :  { %v137_v35 = vand.u32 %v1071_v27, %v135_v34  ;;  %v985_v36 = vpack.i.bf16 %v387_v30, %v386_v29 }
   0x9   :  { %v980_v37 = vpack.i.bf16 %v385_v33, %v384_v32 }
   0xa   :  { %966 = vrot.lane.b32.xlu1 %v965_v19, %s1088_s19  ;;  %956 = vrot.lane.b32.xlu0 %v955_v20, %s1088_s19 }
   0xb   :  { %923 = vmatprep.subr.bf16.mxu0 %v137_v35  ;;  %942 = vmatprep.subr.bf16.mxu1 %v137_v35 }
   0xc   :  { %924 = vmatpush3.bf16.msra.mxu0 %v137_v35  ;;  %944 = vmatpush3.bf16.msra.mxu1 %v137_v35 }
   0xe   :  { %976 = vrot.lane.b32.xlu1 %v975_v28, %s1088_s19  ;;  %971 = vrot.lane.b32.xlu0 %v970_v31, %s1088_s19 }
   0xf   :  { %926 = vmatmul.mubr.msk.bf16.vlgmr.msra.gmra.mrb[0].mxu0 %vm107_vm2, %v1160_v7  ;;  %934 = vmatmul.mubr.msk.bf16.vlgmr.msra.gmra.mrb[0].mxu1 %vm107_vm2, %v1165_v8 }
  0x10   :  { %929 = vmatprep.mubr.msk.bf16.mxu0 %vm107_vm2, %v1141_v0  ;;  %937 = vmatprep.mubr.msk.bf16.mxu1 %vm107_vm2, %v1212_v24 }
  0x12   :  { %986 = vrot.lane.b32.xlu1 %v985_v36, %s1088_s19  ;;  %981 = vrot.lane.b32.xlu0 %v980_v37, %s1088_s19 }
  0x16   :  { %996 = vrot.lane.b32.xlu1 %v955_v20, %s1090_s0  ;;  %991 = vrot.lane.b32.xlu0 %v950_v15, %s1090_s0 }
  0x17   :  { %930 = vmatmul.mubr.msk.bf16.gmra.mrb[4].mxu0 %vm107_vm2, %v1151_v2  ;;  %938 = vmatmul.mubr.msk.bf16.gmra.mrb[4].mxu1 %vm107_vm2, %v1207_v23 }
  0x1a   :  { %1006 = vrot.lane.b32.xlu1 %v965_v19, %s1090_s0  ;;  %1001 = vrot.lane.b32.xlu0 %v1180_v14, %s1090_s0 }
  0x1e   :  { %1016 = vrot.lane.b32.xlu1 %v975_v28, %s1090_s0  ;;  %1011 = vrot.lane.b32.xlu0 %v970_v31, %s1090_s0 }
  0x22   :  { %1026 = vrot.lane.b32.xlu1 %v985_v36, %s1090_s0  ;;  %1021 = vrot.lane.b32.xlu0 %v980_v37, %s1090_s0 }
  0x26   :  { %1036 = vrot.lane.b32.xlu1 %v955_v20, %s1091_s1  ;;  %1031 = vrot.lane.b32.xlu0 %v950_v15, %s1091_s1 }
  0x2a   :  { %1046 = vrot.lane.b32.xlu1 %v965_v19, %s1091_s1  ;;  %1041 = vrot.lane.b32.xlu0 %v1180_v14, %s1091_s1 }
  0x2e   :  { %1056 = vrot.lane.b32.xlu1 %v975_v28, %s1091_s1  ;;  %1051 = vrot.lane.b32.xlu0 %v970_v31, %s1091_s1 }
  0x32   :  { %1066 = vrot.lane.b32.xlu1 %v985_v36, %s1091_s1  ;;  %1061 = vrot.lane.b32.xlu0 %v980_v37, %s1091_s1 }
  0x36   :  { %602 = vrot.lane.b32.xlu0 %v860_v38, %s1092_s30  ;;  %627 = vrot.lane.b32.xlu1 %v861_v39, %s1092_s30 }
  0x3a   :  { %668 = vrot.lane.b32.xlu0 %v862_v40, %s1092_s30 }
  0x78   :  { %v962_v41 = vpop.permute.xlu1 %961  ;;  %v952_v42 = vpop.permute.xlu0 %951 }
  0x79   :  { %v964_v55 = vunpack.i.h.bf16 %v962_v41  ;;  %v963_v56 = vunpack.i.l.bf16 %v962_v41  ;;  %v954_v57 = vunpack.i.h.bf16 %v952_v42  ;;  %v953_v58 = vunpack.i.l.bf16 %v952_v42 }
  0x7b   :  { %v457_v25 = vmax.f32 %v377_v4, %v964_v55  ;;  %v456_v26 = vmax.f32 %v376_v3, %v963_v56  ;;  %v453_v27 = vmax.f32 %v373_v6, %v954_v57  ;;  %v452_v28 = vmax.f32 %v372_v5, %v953_v58 }
  0x7c   :  { %v967_v43 = vpop.permute.xlu1 %966  ;;  %v957_v44 = vpop.permute.xlu0 %956 }
  0x7d   :  { %v969_v59 = vunpack.i.h.bf16 %v967_v43  ;;  %v968_v60 = vunpack.i.l.bf16 %v967_v43  ;;  %v959_v61 = vunpack.i.h.bf16 %v957_v44  ;;  %v958_v62 = vunpack.i.l.bf16 %v957_v44 }
  0x7f   :  { %v459_v31 = vmax.f32 %v379_v10, %v969_v59  ;;  %v458_v34 = vmax.f32 %v378_v9, %v968_v60  ;;  %v455_v35 = vmax.f32 %v375_v12, %v959_v61  ;;  %v454_v4 = vmax.f32 %v374_v11, %v958_v62 }
  0x80   :  { %v977_v45 = vpop.permute.xlu1 %976  ;;  %v972_v46 = vpop.permute.xlu0 %971 }
  0x81   :  { %v979_v63 = vunpack.i.h.bf16 %v977_v45  ;;  %v978_v14 = vunpack.i.l.bf16 %v977_v45  ;;  %v974_v15 = vunpack.i.h.bf16 %v972_v46  ;;  %v973_v20 = vunpack.i.l.bf16 %v972_v46 }
  0x83   :  { %v463_v0 = vmax.f32 %v383_v17, %v979_v63  ;;  %v462_v3 = vmax.f32 %v382_v16, %v978_v14  ;;  %v461_v1 = vmax.f32 %v381_v22, %v974_v15  ;;  %v460_v2 = vmax.f32 %v380_v21, %v973_v20 }
  0x84   :  { %v987_v47 = vpop.permute.xlu1 %986  ;;  %v982_v48 = vpop.permute.xlu0 %981 }
  0x85   :  { %v989_v9 = vunpack.i.h.bf16 %v987_v47  ;;  %v988_v10 = vunpack.i.l.bf16 %v987_v47  ;;  %v984_v12 = vunpack.i.h.bf16 %v982_v48  ;;  %v983_v7 = vunpack.i.l.bf16 %v982_v48 }
  0x87   :  { %v1314_v13 = vmax.f32 %v387_v30, %v989_v9  ;;  %v466_v21 = vmax.f32 %v386_v29, %v988_v10  ;;  %v465_v44 = vmax.f32 %v385_v33, %v984_v12  ;;  %v464_v46 = vmax.f32 %v384_v32, %v983_v7 }
  0x88   :  { %v997_v49 = vpop.permute.xlu1 %996  ;;  %v992_v50 = vpop.permute.xlu0 %991 }
  0x89   :  { %v999_v11 = vunpack.i.h.bf16 %v997_v49  ;;  %v998_v36 = vunpack.i.l.bf16 %v997_v49  ;;  %v993_v37 = vunpack.i.l.bf16 %v992_v50  ;;  %v994_v17 = vunpack.i.h.bf16 %v992_v50 }
  0x8b   :  { %v518_v47 = vmax.f32 %v454_v4, %v998_v36  ;;  %v519_v48 = vmax.f32 %v455_v35, %v999_v11  ;;  %v516_v49 = vmax.f32 %v452_v28, %v993_v37  ;;  %v517_v50 = vmax.f32 %v453_v27, %v994_v17 }
  0x8c   :  { %v1007_v51 = vpop.permute.xlu1 %1006  ;;  %v1002_v52 = vpop.permute.xlu0 %1001 }
  0x8d   :  { %v1009_v38 = vunpack.i.h.bf16 %v1007_v51  ;;  %v1008_v8 = vunpack.i.l.bf16 %v1007_v51  ;;  %v1004_v16 = vunpack.i.h.bf16 %v1002_v52  ;;  %v1003_v39 = vunpack.i.l.bf16 %v1002_v52 }
  0x8f   :  { %v523_v51 = vmax.f32 %v459_v31, %v1009_v38  ;;  %v522_v52 = vmax.f32 %v458_v34, %v1008_v8  ;;  %v520_v30 = vmax.f32 %v456_v26, %v1003_v39 }
  0x90   :  { %v1017_v53 = vpop.permute.xlu1 %1016  ;;  %v1279_v54 = vpop.permute.xlu0 %1011 }
  0x91   :  { %v1019_v40 = vunpack.i.h.bf16 %v1017_v53  ;;  %v1018_v22 = vunpack.i.l.bf16 %v1017_v53  ;;  %v1013_v41 = vunpack.i.l.bf16 %v1279_v54  ;;  %v1014_v45 = vunpack.i.h.bf16 %v1279_v54 }
  0x92   :  { %v521_v53 = vmax.f32 %v457_v25, %v1004_v16 }
  0x93   :  { %v527_v55 = vmax.f32 %v463_v0, %v1019_v40  ;;  %v526_v56 = vmax.f32 %v462_v3, %v1018_v22  ;;  %v524_v23 = vmax.f32 %v460_v2, %v1013_v41  ;;  %v525_v58 = vmax.f32 %v461_v1, %v1014_v45 }
  0x94   :  { %v1281_v18 = vpop.permute.xlu1 %1026  ;;  %v1283_v19 = vpop.permute.xlu0 %1021 }
  0x95   :  { %v1028_v33 = vunpack.i.l.bf16 %v1281_v18  ;;  %v1024_v54 = vunpack.i.h.bf16 %v1283_v19  ;;  %v1023_v24 = vunpack.i.l.bf16 %v1283_v19  ;;  %v1029_v19 = vunpack.i.h.bf16 %v1281_v18 }
  0x97   :  { %v1333_v34 = vmax.f32 %v466_v21, %v1028_v33  ;;  %v1335_v35 = vmax.f32 %v464_v46, %v1023_v24  ;;  %v1337_v4 = vmax.f32 %v465_v44, %v1024_v54 }
  0x98   :  { %v1037_v5 = vpop.permute.xlu1 %1036  ;;  %v1307_v6 = vpop.permute.xlu0 %1031 }
  0x99   :  { %v1039_v32 = vunpack.i.h.bf16 %v1037_v5  ;;  %v1038_v59 = vunpack.i.l.bf16 %v1037_v5  ;;  %v1034_v60 = vunpack.i.h.bf16 %v1307_v6  ;;  %v1033_v61 = vunpack.i.l.bf16 %v1307_v6 }
  0x9b   :  { %v582_v0 = vmax.f32 %v518_v47, %v1038_v59  ;;  %v583_v3 = vmax.f32 %v519_v48, %v1039_v32  ;;  %v580_v1 = vmax.f32 %v516_v49, %v1033_v61  ;;  %v581_v5 = vmax.f32 %v517_v50, %v1034_v60 }
  0x9c   :  { %v1047_v42 = vpop.permute.xlu1 %1046  ;;  %v1042_v43 = vpop.permute.xlu0 %1041 }
  0x9d   :  { %v1049_v62 = vunpack.i.h.bf16 %v1047_v42  ;;  %v1048_v63 = vunpack.i.l.bf16 %v1047_v42  ;;  %v1044_v14 = vunpack.i.h.bf16 %v1042_v43  ;;  %v1043_v15 = vunpack.i.l.bf16 %v1042_v43 }
  0x9f   :  { %v586_v6 = vmax.f32 %v522_v52, %v1048_v63  ;;  %v587_v2 = vmax.f32 %v523_v51, %v1049_v62  ;;  %v584_v9 = vmax.f32 %v520_v30, %v1043_v15  ;;  %v585_v10 = vmax.f32 %v521_v53, %v1044_v14 }
  0xa0   :  { %v1057_v29 = vpop.permute.xlu1 %1056  ;;  %v1052_v57 = vpop.permute.xlu0 %1051 }
  0xa1   :  { %v1059_v20 = vunpack.i.h.bf16 %v1057_v29  ;;  %v1058_v25 = vunpack.i.l.bf16 %v1057_v29  ;;  %v1054_v26 = vunpack.i.h.bf16 %v1052_v57  ;;  %v1053_v27 = vunpack.i.l.bf16 %v1052_v57 }
  0xa3   :  { %v590_v12 = vmax.f32 %v526_v56, %v1058_v25  ;;  %v591_v7 = vmax.f32 %v527_v55, %v1059_v20  ;;  %v588_v11 = vmax.f32 %v524_v23, %v1053_v27  ;;  %v589_v36 = vmax.f32 %v525_v58, %v1054_v26 }
  0xa4   :  { %v1328_v28 = vpop.permute.xlu1 %1066  ;;  %v1330_v31 = vpop.permute.xlu0 %1061 }
  0xa5   :  { %v1069_v54 = vunpack.i.h.bf16 %v1328_v28  ;;  %v1068_v24 = vunpack.i.l.bf16 %v1328_v28  ;;  %v1064_v32 = vunpack.i.h.bf16 %v1330_v31  ;;  %v1063_v59 = vunpack.i.l.bf16 %v1330_v31 }
  0xa7   :  { %v593_v28 = vmax.f32 %v1337_v4, %v1064_v32 }
  0xa8   :  { %v1339_v37 = vpop.permute.xlu0 %602  ;;  %v1341_v17 = vpop.permute.xlu1 %627 }
  0xa9   :  { %v606_v38 = vmul.f32 %v1339_v37, %v581_v5  ;;  %v605_v8 = vmul.f32 %v1339_v37, %v580_v1  ;;  %v608_v16 = vmul.f32 %v1339_v37, %v583_v3  ;;  %v607_v39 = vmul.f32 %v1339_v37, %v582_v0 }
  0xaa   :  { %v610_v40 = vmul.f32 %v1339_v37, %v585_v10  ;;  %v609_v22 = vmul.f32 %v1339_v37, %v584_v9  ;;  %v612_v41 = vmul.f32 %v1339_v37, %v587_v2  ;;  %v611_v42 = vmul.f32 %v1339_v37, %v586_v6 }
  0xab   :  { %v631_v43 = vadd.f32 %v1341_v17, %v606_v38  ;;  %v630_v21 = vadd.f32 %v1341_v17, %v605_v8  ;;  %v633_v44 = vadd.f32 %v1341_v17, %v608_v16  ;;  %v632_v45 = vadd.f32 %v1341_v17, %v607_v39 }
  0xac   :  { %v1355_v46 = vpop.permute.xlu0 %668  ;;  %v635_v47 = vadd.f32 %v1341_v17, %v610_v40  ;;  %v634_v48 = vadd.f32 %v1341_v17, %v609_v22  ;;  %v637_v49 = vadd.f32 %v1341_v17, %v612_v41  ;;  %v636_v50 = vadd.f32 %v1341_v17, %v611_v42 }
  0xad   :  { %vm647_vm3 = vcmp.ge.f32.partialorder %v631_v43, 0.0  ;;  %v672_v51 = vmul.f32 %v1355_v46, %v631_v43  ;;  %vm646_vm4 = vcmp.ge.f32.partialorder %v630_v21, 0.0  ;;  %v671_v52 = vmul.f32 %v1355_v46, %v630_v21 }
  0xae   :  { %vm649_vm5 = vcmp.ge.f32.partialorder %v633_v44, 0.0  ;;  %v674_v53 = vmul.f32 %v1355_v46, %v633_v44  ;;  %vm648_vm6 = vcmp.ge.f32.partialorder %v632_v45, 0.0  ;;  %v673_v30 = vmul.f32 %v1355_v46, %v632_v45 }
  0xaf   :  { %v688_v55 = vsel %vm647_vm3, %v631_v43, %v672_v51  ;;  %v687_v56 = vsel %vm646_vm4, %v630_v21, %v671_v52  ;;  %vm651_vm7 = vcmp.ge.f32.partialorder %v635_v47, 0.0  ;;  %v676_v23 = vmul.f32 %v1355_v46, %v635_v47 }
  0xb0   :  { %v896_v29 = vpack.c.bf16 %v688_v55, %v688_v55  ;;  %v895_v57 = vpack.c.bf16 %v687_v56, %v687_v56  ;;  %v690_v58 = vsel %vm649_vm5, %v633_v44, %v674_v53  ;;  %v689_v33 = vsel %vm648_vm6, %v632_v45, %v673_v30 }
  0xb1   :  { %v898_v60 = vpack.c.bf16 %v690_v58, %v690_v58  ;;  %v897_v61 = vpack.c.bf16 %v689_v33, %v689_v33  ;;  %vm650_vm8 = vcmp.ge.f32.partialorder %v634_v48, 0.0  ;;  %v675_v62 = vmul.f32 %v1355_v46, %v634_v48 }
  0xb2   :  { %753 = vrot.lane.b32.xlu0 %v896_v29, %s1091_s1  ;;  %751 = vrot.lane.b32.xlu1 %v895_v57, %s1091_s1  ;;  %v692_v63 = vsel %vm651_vm7, %v635_v47, %v676_v23  ;;  %v678_v14 = vmul.f32 %v1355_v46, %v637_v49  ;;  %v614_v15 = vmul.f32 %v1339_v37, %v589_v36  ;;  %vm653_vm9 = vcmp.ge.f32.partialorder %v637_v49, 0.0 }
  0xb3   :  { %v613_v20 = vmul.f32 %v1339_v37, %v588_v11  ;;  %v677_v25 = vmul.f32 %v1355_v46, %v636_v50  ;;  %v616_v26 = vmul.f32 %v1339_v37, %v591_v7  ;;  %v615_v27 = vmul.f32 %v1339_v37, %v590_v12 }
  0xb4   :  { %v691_v31 = vsel %vm650_vm8, %v634_v48, %v675_v62  ;;  %vm652_vm10 = vcmp.ge.f32.partialorder %v636_v50, 0.0  ;;  %v639_v0 = vadd.f32 %v1341_v17, %v614_v15  ;;  %v531_v3 = vmax.f32 %v1314_v13, %v1029_v19 }
  0xb5   :  { %v594_v1 = vmax.f32 %v1333_v34, %v1068_v24  ;;  %v638_v5 = vadd.f32 %v1341_v17, %v613_v20  ;;  %v592_v6 = vmax.f32 %v1335_v35, %v1063_v59  ;;  %v900_v2 = vpack.c.bf16 %v692_v63, %v692_v63 }
  0xb6   :  { %757 = vrot.lane.b32.xlu0 %v898_v60, %s1091_s1  ;;  %755 = vrot.lane.b32.xlu1 %v897_v61, %s1091_s1  ;;  %v694_v4 = vsel %vm653_vm9, %v637_v49, %v678_v14  ;;  %v641_v9 = vadd.f32 %v1341_v17, %v616_v26  ;;  %v899_v10 = vpack.c.bf16 %v691_v31, %v691_v31  ;;  %vm655_vm11 = vcmp.ge.f32.partialorder %v639_v0, 0.0 }
  0xb7   :  { %v693_v12 = vsel %vm652_vm10, %v636_v50, %v677_v25  ;;  %v680_v18 = vmul.f32 %v1355_v46, %v639_v0  ;;  %v640_v13 = vadd.f32 %v1341_v17, %v615_v27  ;;  %v595_v19 = vmax.f32 %v531_v3, %v1069_v54  ;;  %v1428_v54 = vld [vmem:[%s1596_s5] ss:$0 sm:$0xff] }
  0xb8   :  { %v679_v34 = vmul.f32 %v1355_v46, %v638_v5  ;;  %v618_v7 = vmul.f32 %v1339_v37, %v593_v28  ;;  %vm654_vm12 = vcmp.ge.f32.partialorder %v638_v5, 0.0  ;;  %v902_v35 = vpack.c.bf16 %v694_v4, %v694_v4 }
  0xb9   :  { %v901_v11 = vpack.c.bf16 %v693_v12, %v693_v12  ;;  %vm657_vm13 = vcmp.ge.f32.partialorder %v641_v9, 0.0  ;;  %v682_v36 = vmul.f32 %v1355_v46, %v641_v9  ;;  %v696_v38 = vsel %vm655_vm11, %v639_v0, %v680_v18 }
  0xba   :  { %761 = vrot.lane.b32.xlu0 %v900_v2, %s1091_s1  ;;  %759 = vrot.lane.b32.xlu1 %v899_v10, %s1091_s1  ;;  %vm656_vm14 = vcmp.ge.f32.partialorder %v640_v13, 0.0  ;;  %v681_v8 = vmul.f32 %v1355_v46, %v640_v13  ;;  %v617_v16 = vmul.f32 %v1339_v37, %v592_v6  ;;  %v695_v39 = vsel %vm654_vm12, %v638_v5, %v679_v34 }
  0xbb   :  { %v643_v40 = vadd.f32 %v1341_v17, %v618_v7  ;;  %v620_v22 = vmul.f32 %v1339_v37, %v595_v19  ;;  %v619_v41 = vmul.f32 %v1339_v37, %v594_v1  ;;  %v904_v43 = vpack.c.bf16 %v696_v38, %v696_v38 }
  0xbc   :  { %v642_v42 = vadd.f32 %v1341_v17, %v617_v16  ;;  %v903_v21 = vpack.c.bf16 %v695_v39, %v695_v39  ;;  %v698_v44 = vsel %vm657_vm13, %v641_v9, %v682_v36  ;;  %v697_v45 = vsel %vm656_vm14, %v640_v13, %v681_v8 }
  0xbd   :  { %v684_v47 = vmul.f32 %v1355_v46, %v643_v40  ;;  %v645_v49 = vadd.f32 %v1341_v17, %v620_v22  ;;  %v644_v50 = vadd.f32 %v1341_v17, %v619_v41  ;;  %vm659_vm15 = vcmp.ge.f32.partialorder %v643_v40, 0.0 }
  0xbe   :  { %765 = vrot.lane.b32.xlu0 %v902_v35, %s1091_s1  ;;  %763 = vrot.lane.b32.xlu1 %v901_v11, %s1091_s1  ;;  %v683_v48 = vmul.f32 %v1355_v46, %v642_v42  ;;  %vm658_vm0 = vcmp.ge.f32.partialorder %v642_v42, 0.0  ;;  %v906_v37 = vpack.c.bf16 %v698_v44, %v698_v44  ;;  %v905_v51 = vpack.c.bf16 %v697_v45, %v697_v45 }
  0xbf   :  { %v700_v52 = vsel %vm659_vm15, %v643_v40, %v684_v47  ;;  %v686_v30 = vmul.f32 %v1355_v46, %v645_v49  ;;  %v685_v55 = vmul.f32 %v1355_v46, %v644_v50  ;;  %vm661_vm1 = vcmp.ge.f32.partialorder %v645_v49, 0.0  ;;  %v1423_v46 = vld [vmem:[%s1595_s2] ss:$0 sm:$0xff] }
  0xc0   :  { %v699_v53 = vsel %vm658_vm0, %v642_v42, %v683_v48  ;;  %vm660_vm2 = vcmp.ge.f32.partialorder %v644_v50, 0.0  ;;  %v908_v17 = vpack.c.bf16 %v700_v52, %v700_v52  ;;  %vm355_vm3 = vcmask 35840  }
  0xc1   :  { %v907_v56 = vpack.c.bf16 %v699_v53, %v699_v53  ;;  %v702_v23 = vsel %vm661_vm1, %v645_v49, %v686_v30  ;;  %v701_v29 = vsel %vm660_vm2, %v644_v50, %v685_v55 }
  0xc2   :  { %769 = vrot.lane.b32.xlu0 %v904_v43, %s1091_s1  ;;  %767 = vrot.lane.b32.xlu1 %v903_v21, %s1091_s1  ;;  %v910_v57 = vpack.c.bf16 %v702_v23, %v702_v23  ;;  %v909_v58 = vpack.c.bf16 %v701_v29, %v701_v29 }
  0xc6   :  { %773 = vrot.lane.b32.xlu0 %v906_v37, %s1091_s1  ;;  %771 = vrot.lane.b32.xlu1 %v905_v51, %s1091_s1 }
  0xca   :  { %777 = vrot.lane.b32.xlu0 %v908_v17, %s1091_s1  ;;  %775 = vrot.lane.b32.xlu1 %v907_v56, %s1091_s1 }
  0xce   :  { %781 = vrot.lane.b32.xlu0 %v910_v57, %s1091_s1  ;;  %779 = vrot.lane.b32.xlu1 %v909_v58, %s1091_s1 }
  0xe2   :  { %v927_v33 = vpop.f32.mrb[0].mxu0  ;;  %v935_v24 = vpop.f32.mrb[0].mxu1 }
  0xe3   :  { %v182_v32 = vadd.f32 %v927_v33, %v1423_v46  ;;  %v214_v59 = vadd.f32 %v935_v24, %v1423_v46  ;;  %v173_v60 = vpop.f32.mrb[1].mxu0  ;;  %v205_v61 = vpop.f32.mrb[1].mxu1 }
  0xe4   :  { %v174_v62 = vadd.f32 %v1423_v46, %v173_v60  ;;  %v206_v63 = vadd.f32 %v1423_v46, %v205_v61  ;;  %v928_v14 = vpop.f32.mrb[2].mxu0  ;;  %v936_v15 = vpop.f32.mrb[2].mxu1 }
  0xe5   :  { %vm238_vm4 = vcmp.ge.f32.partialorder %v182_v32, 0.0  ;;  %v261_v20 = vmul.f32 %v1428_v54, %v182_v32  ;;  %vm246_vm5 = vcmp.ge.f32.partialorder %v214_v59, 0.0  ;;  %v269_v25 = vmul.f32 %v1428_v54, %v214_v59  ;;  %v208_v26 = vpop.f32.mrb[3].mxu1  ;;  %v176_v27 = vpop.f32.mrb[3].mxu0 }
  0xe6   :  { %vm236_vm6 = vcmp.ge.f32.partialorder %v174_v62, 0.0  ;;  %v259_v28 = vmul.f32 %v1428_v54, %v174_v62  ;;  %vm244_vm7 = vcmp.ge.f32.partialorder %v206_v63, 0.0  ;;  %v267_v31 = vmul.f32 %v1428_v54, %v206_v63 }
  0xe7   :  { %v277_v0 = vsel %vm238_vm4, %v182_v32, %v261_v20  ;;  %v285_v3 = vsel %vm246_vm5, %v214_v59, %v269_v25  ;;  %v185_v1 = vadd.f32 %v928_v14, %v1423_v46  ;;  %v217_v5 = vadd.f32 %v936_v15, %v1423_v46 }
  0xe8   :  { %v881_v6 = vpack.c.bf16 %v277_v0, %v277_v0  ;;  %v889_v2 = vpack.c.bf16 %v285_v3, %v285_v3  ;;  %v275_v4 = vsel %vm236_vm6, %v174_v62, %v259_v28  ;;  %v283_v9 = vsel %vm244_vm7, %v206_v63, %v267_v31 }
  0xe9   :  { %v879_v10 = vpack.c.bf16 %v275_v4, %v275_v4  ;;  %v887_v12 = vpack.c.bf16 %v283_v9, %v283_v9  ;;  %vm239_vm8 = vcmp.ge.f32.partialorder %v185_v1, 0.0  ;;  %v262_v18 = vmul.f32 %v1428_v54, %v185_v1 }
  0xea   :  { %358 = vst.msk [vmem:[%s1597_s7 + $0x8] sm:$0xf] %vm355_vm3, %v881_v6  ;;  %366 = vst.msk [vmem:[%s1597_s7 + $0x28] sm:$0xf] %vm355_vm3, %v889_v2  ;;  %vm247_vm9 = vcmp.ge.f32.partialorder %v217_v5, 0.0  ;;  %v270_v13 = vmul.f32 %v1428_v54, %v217_v5  ;;  %v209_v19 = vadd.f32 %v1423_v46, %v208_v26  ;;  %v177_v34 = vadd.f32 %v1423_v46, %v176_v27  ;;  %v931_v7 = vpop.f32.mrb[4].mxu0 }
  0xeb   :  { %v939_v35 = vpop.f32.mrb[4].mxu1  ;;  %356 = vst.msk [vmem:[%s1597_s7] sm:$0xf] %vm355_vm3, %v879_v10  ;;  %364 = vst.msk [vmem:[%s1597_s7 + $0x20] sm:$0xf] %vm355_vm3, %v887_v12  ;;  %v278_v11 = vsel %vm239_vm8, %v185_v1, %v262_v18  ;;  %v198_v36 = vadd.f32 %v931_v7, %v1423_v46  ;;  %v189_v8 = vpop.f32.mrb[5].mxu0 }
  0xec   :  { %v230_v38 = vadd.f32 %v939_v35, %v1423_v46  ;;  %v221_v16 = vpop.f32.mrb[5].mxu1  ;;  %v882_v39 = vpack.c.bf16 %v278_v11, %v278_v11  ;;  %v286_v40 = vsel %vm247_vm9, %v217_v5, %v270_v13  ;;  %vm245_vm10 = vcmp.ge.f32.partialorder %v209_v19, 0.0  ;;  %v932_v41 = vpop.f32.mrb[6].mxu0 }
  0xed   :  { %v268_v22 = vmul.f32 %v1428_v54, %v209_v19  ;;  %v940_v42 = vpop.f32.mrb[6].mxu1  ;;  %v890_v43 = vpack.c.bf16 %v286_v40, %v286_v40  ;;  %vm237_vm11 = vcmp.ge.f32.partialorder %v177_v34, 0.0  ;;  %v260_v21 = vmul.f32 %v1428_v54, %v177_v34  ;;  %v192_v45 = vpop.f32.mrb[7].mxu0 }
  0xee   :  { %vm242_vm12 = vcmp.ge.f32.partialorder %v198_v36, 0.0  ;;  %v224_v44 = vpop.f32.mrb[7].mxu1  ;;  %359 = vst.msk [vmem:[%s1597_s7 + $0xc] sm:$0xf] %vm355_vm3, %v882_v39  ;;  %v265_v48 = vmul.f32 %v1428_v54, %v198_v36  ;;  %vm250_vm13 = vcmp.ge.f32.partialorder %v230_v38, 0.0  ;;  %v273_v49 = vmul.f32 %v1428_v54, %v230_v38 }
  0xef   :  { %v284_v47 = vsel %vm245_vm10, %v209_v19, %v268_v22  ;;  %367 = vst.msk [vmem:[%s1597_s7 + $0x2c] sm:$0xf] %vm355_vm3, %v890_v43  ;;  %v276_v37 = vsel %vm237_vm11, %v177_v34, %v260_v21  ;;  %v190_v51 = vadd.f32 %v1423_v46, %v189_v8  ;;  %v222_v52 = vadd.f32 %v1423_v46, %v221_v16 }
  0xf0   :  { %v888_v50 = vpack.c.bf16 %v284_v47, %v284_v47  ;;  %v880_v53 = vpack.c.bf16 %v276_v37, %v276_v37  ;;  %v281_v30 = vsel %vm242_vm12, %v198_v36, %v265_v48  ;;  %v289_v55 = vsel %vm250_vm13, %v230_v38, %v273_v49 }
  0xf1   :  { %v201_v17 = vadd.f32 %v932_v41, %v1423_v46  ;;  %v885_v56 = vpack.c.bf16 %v281_v30, %v281_v30  ;;  %v893_v23 = vpack.c.bf16 %v289_v55, %v289_v55  ;;  %vm240_vm14 = vcmp.ge.f32.partialorder %v190_v51, 0.0 }
  0xf2   :  { %365 = vst.msk [vmem:[%s1597_s7 + $0x24] sm:$0xf] %vm355_vm3, %v888_v50  ;;  %v263_v29 = vmul.f32 %v1428_v54, %v190_v51  ;;  %357 = vst.msk [vmem:[%s1597_s7 + $0x4] sm:$0xf] %vm355_vm3, %v880_v53  ;;  %vm248_vm15 = vcmp.ge.f32.partialorder %v222_v52, 0.0  ;;  %v271_v57 = vmul.f32 %v1428_v54, %v222_v52  ;;  %v233_v24 = vadd.f32 %v940_v42, %v1423_v46 }
  0xf3   :  { %vm243_vm0 = vcmp.ge.f32.partialorder %v201_v17, 0.0  ;;  %v266_v58 = vmul.f32 %v1428_v54, %v201_v17  ;;  %362 = vst.msk [vmem:[%s1597_s7 + $0x18] sm:$0xf] %vm355_vm3, %v885_v56  ;;  %370 = vst.msk [vmem:[%s1597_s7 + $0x38] sm:$0xf] %vm355_vm3, %v893_v23  ;;  %v225_v32 = vadd.f32 %v1423_v46, %v224_v44  ;;  %v193_v59 = vadd.f32 %v1423_v46, %v192_v45 }
  0xf4   :  { %v279_v33 = vsel %vm240_vm14, %v190_v51, %v263_v29  ;;  %v287_v61 = vsel %vm248_vm15, %v222_v52, %v271_v57  ;;  %vm251_vm1 = vcmp.ge.f32.partialorder %v233_v24, 0.0  ;;  %v274_v15 = vmul.f32 %v1428_v54, %v233_v24 }
  0xf5   :  { %v883_v60 = vpack.c.bf16 %v279_v33, %v279_v33  ;;  %v282_v62 = vsel %vm243_vm0, %v201_v17, %v266_v58  ;;  %v891_v63 = vpack.c.bf16 %v287_v61, %v287_v61  ;;  %vm249_vm2 = vcmp.ge.f32.partialorder %v225_v32, 0.0 }
  0xf6   :  { %v886_v14 = vpack.c.bf16 %v282_v62, %v282_v62  ;;  %v272_v20 = vmul.f32 %v1428_v54, %v225_v32  ;;  %vm241_vm4 = vcmp.ge.f32.partialorder %v193_v59, 0.0  ;;  %v264_v25 = vmul.f32 %v1428_v54, %v193_v59 }
  0xf7   :  { %360 = vst.msk [vmem:[%s1597_s7 + $0x10] sm:$0xf] %vm355_vm3, %v883_v60  ;;  %368 = vst.msk [vmem:[%s1597_s7 + $0x30] sm:$0xf] %vm355_vm3, %v891_v63  ;;  %v290_v46 = vsel %vm251_vm1, %v233_v24, %v274_v15  ;;  %vm799_vm5 = vcmask 19456  }
  0xf8   :  { %363 = vst.msk [vmem:[%s1597_s7 + $0x1c] sm:$0xf] %vm355_vm3, %v886_v14  ;;  %v894_v26 = vpack.c.bf16 %v290_v46, %v290_v46  ;;  %v288_v27 = vsel %vm249_vm2, %v225_v32, %v272_v20  ;;  %v280_v28 = vsel %vm241_vm4, %v193_v59, %v264_v25 }
  0xf9   :  { %v892_v31 = vpack.c.bf16 %v288_v27, %v288_v27  ;;  %v884_v0 = vpack.c.bf16 %v280_v28, %v280_v28 }
  0xfa   :  { %371 = vst.msk [vmem:[%s1597_s7 + $0x3c] sm:$0xf] %vm355_vm3, %v894_v26 }
  0xfb   :  { %369 = vst.msk [vmem:[%s1597_s7 + $0x34] sm:$0xf] %vm355_vm3, %v892_v31  ;;  %361 = vst.msk [vmem:[%s1597_s7 + $0x14] sm:$0xf] %vm355_vm3, %v884_v0 }
 0x124   :  { %v754_v54 = vpop.permute.xlu0 %753  ;;  %v752_v3 = vpop.permute.xlu1 %751 }
 0x125   :  { %801 = vst.msk [vmem:[%s1598_s8 + $0x4] sm:$0xf] %vm799_vm5, %v754_v54  ;;  %800 = vst.msk [vmem:[%s1598_s8] sm:$0xf] %vm799_vm5, %v752_v3 }
 0x128   :  { %v758_v1 = vpop.permute.xlu0 %757  ;;  %v756_v5 = vpop.permute.xlu1 %755 }
 0x129   :  { %803 = vst.msk [vmem:[%s1598_s8 + $0xc] sm:$0xf] %vm799_vm5, %v758_v1  ;;  %802 = vst.msk [vmem:[%s1598_s8 + $0x8] sm:$0xf] %vm799_vm5, %v756_v5 }
 0x12c   :  { %v762_v6 = vpop.permute.xlu0 %761  ;;  %v760_v2 = vpop.permute.xlu1 %759 }
 0x12d   :  { %805 = vst.msk [vmem:[%s1598_s8 + $0x14] sm:$0xf] %vm799_vm5, %v762_v6  ;;  %804 = vst.msk [vmem:[%s1598_s8 + $0x10] sm:$0xf] %vm799_vm5, %v760_v2 }
 0x130   :  { %v766_v4 = vpop.permute.xlu0 %765  ;;  %v764_v9 = vpop.permute.xlu1 %763 }
 0x131   :  { %807 = vst.msk [vmem:[%s1598_s8 + $0x1c] sm:$0xf] %vm799_vm5, %v766_v4  ;;  %806 = vst.msk [vmem:[%s1598_s8 + $0x18] sm:$0xf] %vm799_vm5, %v764_v9 }
 0x134   :  { %v770_v10 = vpop.permute.xlu0 %769  ;;  %v768_v12 = vpop.permute.xlu1 %767 }
 0x135   :  { %809 = vst.msk [vmem:[%s1598_s8 + $0x24] sm:$0xf] %vm799_vm5, %v770_v10  ;;  %808 = vst.msk [vmem:[%s1598_s8 + $0x20] sm:$0xf] %vm799_vm5, %v768_v12 }
 0x138   :  { %v774_v18 = vpop.permute.xlu0 %773  ;;  %v772_v13 = vpop.permute.xlu1 %771 }
 0x139   :  { %811 = vst.msk [vmem:[%s1598_s8 + $0x2c] sm:$0xf] %vm799_vm5, %v774_v18  ;;  %810 = vst.msk [vmem:[%s1598_s8 + $0x28] sm:$0xf] %vm799_vm5, %v772_v13 }
 0x13c   :  { %v778_v19 = vpop.permute.xlu0 %777  ;;  %v776_v34 = vpop.permute.xlu1 %775 }
 0x13d   :  { %813 = vst.msk [vmem:[%s1598_s8 + $0x34] sm:$0xf] %vm799_vm5, %v778_v19  ;;  %812 = vst.msk [vmem:[%s1598_s8 + $0x30] sm:$0xf] %vm799_vm5, %v776_v34 }
 0x140   :  { %v782_v7 = vpop.permute.xlu0 %781  ;;  %v780_v35 = vpop.permute.xlu1 %779 }
 0x141   :  { %815 = vst.msk [vmem:[%s1598_s8 + $0x3c] sm:$0xf] %vm799_vm5, %v782_v7  ;;  %814 = vst.msk [vmem:[%s1598_s8 + $0x38] sm:$0xf] %vm799_vm5, %v780_v35 }

// kernel: _lambda_.21
= control target key start
LH: loop header
LB: loop body
LE: loop exit
PB: predicated region body
PF: predicated region fallthrough
CT: control target
= control target key end

     0   :  { %vm115_vm0 = vcmask 1043456   ;;  %vm90_vm1 = vcmask 195584   ;;  %vm296_vm2 = vcmask 60416   ;;  %s539_s1 = inlined_call_operand.vmem [shape: bf16[24,8], index: 1, kind: input, shape index: {}]   ;;  %s540_s0 = inlined_call_operand.vmem [shape: bf16[128,24], index: 0, kind: input, shape index: {}]   ;;  %s541_s2 = inlined_call_operand.vmem [shape: f32[1,8], index: 2, kind: input, shape index: {}]   ;;  %s542_s3 = inlined_call_operand.vmem [shape: bf16[128,8], index: 3, kind: output, shape index: {}]  }
   0x1   :  { %v404_v0 = vld [vmem:[%s539_s1] sm:$0xff]   ;;  %v405_v1 = vld [vmem:[%s539_s1 + $0x8] ss:$0 sps:$4 sm:$0xff]   ;;  %v410_v7 = vld [vmem:[%s540_s0 + $0x10] sm:$0xff]  }
   0x2   :  { %378 = vmatprep.subr.bf16.mxu0 %v404_v0  ;;  %398 = vmatprep.subr.bf16.mxu1 %v404_v0  ;;  %v406_v2 = vld [vmem:[%s540_s0] sm:$0xff]   ;;  %v117_v4 = vsel %vm115_vm0, %v405_v1, 0  ;;  %v408_v5 = vld [vmem:[%s540_s0 + $0x8] sm:$0xff]   ;;  %v411_v8 = vld [vmem:[%s540_s0 + $0x30] sm:$0xff]  }
   0x3   :  { %379 = vmatpush3.bf16.msra.mxu0 %v404_v0  ;;  %400 = vmatpush3.bf16.msra.mxu1 %v404_v0  ;;  %v407_v3 = vld [vmem:[%s540_s0 + $0x20] sm:$0xff]   ;;  %v409_v6 = vld [vmem:[%s540_s0 + $0x28] sm:$0xff]   ;;  %v412_v9 = vld [vmem:[%s540_s0 + $0x18] sm:$0xff]  }
   0x4   :  { %402 = vmatprep.subr.msk.bf16.mxu0 %vm115_vm0, %v405_v1  ;;  %403 = vmatprep.subr.msk.bf16.mxu1 %vm115_vm0, %v405_v1  ;;  %v413_v10 = vld [vmem:[%s540_s0 + $0x38] sm:$0xff]   ;;  %v317_v11 = vld [vmem:[%s541_s2] ss:$0 sm:$0xff] }
   0x5   :  { %382 = vmatprep.mubr.msk.bf16.mxu0 %vm90_vm1, %v406_v2  ;;  %390 = vmatprep.mubr.msk.bf16.mxu1 %vm90_vm1, %v407_v3 }
   0x7   :  { %381 = vmatpush3.bf16.msra.mxu0 %v117_v4  ;;  %401 = vmatpush3.bf16.msra.mxu1 %v117_v4 }
   0xa   :  { %383 = vmatmul.mubr.msk.bf16.vlgmr.msra.gmra.mrb[0].mxu0 %vm90_vm1, %v408_v5  ;;  %391 = vmatmul.mubr.msk.bf16.vlgmr.msra.gmra.mrb[0].mxu1 %vm90_vm1, %v409_v6 }
   0xb   :  { %386 = vmatprep.mubr.msk.bf16.mxu0 %vm90_vm1, %v410_v7  ;;  %394 = vmatprep.mubr.msk.bf16.mxu1 %vm90_vm1, %v411_v8 }
  0x12   :  { %387 = vmatmul.mubr.msk.bf16.gmra.mrb[4].mxu0 %vm90_vm1, %v412_v9  ;;  %395 = vmatmul.mubr.msk.bf16.gmra.mrb[4].mxu1 %vm90_vm1, %v413_v10 }
  0xdd   :  { %v384_v12 = vpop.f32.mrb[0].mxu0  ;;  %v392_v13 = vpop.f32.mrb[0].mxu1 }
  0xde   :  { %v162_v14 = vadd.f32 %v384_v12, %v317_v11  ;;  %v194_v15 = vadd.f32 %v392_v13, %v317_v11  ;;  %v153_v16 = vpop.f32.mrb[1].mxu0  ;;  %v185_v17 = vpop.f32.mrb[1].mxu1 }
  0xdf   :  { %v154_v18 = vadd.f32 %v317_v11, %v153_v16  ;;  %v186_v19 = vadd.f32 %v317_v11, %v185_v17  ;;  %v385_v20 = vpop.f32.mrb[2].mxu0  ;;  %v393_v21 = vpop.f32.mrb[2].mxu1 }
  0xe0   :  { %v218_v22 = vmax.f32 %v162_v14, 0.0  ;;  %v226_v23 = vmax.f32 %v194_v15, 0.0  ;;  %v165_v24 = vadd.f32 %v385_v20, %v317_v11  ;;  %v197_v25 = vadd.f32 %v393_v21, %v317_v11  ;;  %v156_v26 = vpop.f32.mrb[3].mxu0  ;;  %v188_v27 = vpop.f32.mrb[3].mxu1 }
  0xe1   :  { %v216_v28 = vmax.f32 %v154_v18, 0.0  ;;  %v224_v29 = vmax.f32 %v186_v19, 0.0  ;;  %v157_v30 = vadd.f32 %v317_v11, %v156_v26  ;;  %v189_v31 = vadd.f32 %v317_v11, %v188_v27 }
  0xe2   :  { %v354_v32 = vpack.c.bf16 %v218_v22, %v218_v22  ;;  %v362_v33 = vpack.c.bf16 %v226_v23, %v226_v23  ;;  %v219_v34 = vmax.f32 %v165_v24, 0.0  ;;  %v227_v35 = vmax.f32 %v197_v25, 0.0 }
  0xe3   :  { %v352_v36 = vpack.c.bf16 %v216_v28, %v216_v28  ;;  %v360_v37 = vpack.c.bf16 %v224_v29, %v224_v29  ;;  %v217_v38 = vmax.f32 %v157_v30, 0.0  ;;  %v225_v39 = vmax.f32 %v189_v31, 0.0 }
  0xe4   :  { %299 = vst.msk [vmem:[%s542_s3 + $0x8] sm:$0xf] %vm296_vm2, %v354_v32  ;;  %307 = vst.msk [vmem:[%s542_s3 + $0x28] sm:$0xf] %vm296_vm2, %v362_v33  ;;  %v355_v40 = vpack.c.bf16 %v219_v34, %v219_v34  ;;  %v363_v41 = vpack.c.bf16 %v227_v35, %v227_v35 }
  0xe5   :  { %297 = vst.msk [vmem:[%s542_s3] sm:$0xf] %vm296_vm2, %v352_v36  ;;  %305 = vst.msk [vmem:[%s542_s3 + $0x20] sm:$0xf] %vm296_vm2, %v360_v37  ;;  %v353_v42 = vpack.c.bf16 %v217_v38, %v217_v38  ;;  %v361_v43 = vpack.c.bf16 %v225_v39, %v225_v39  ;;  %v388_v44 = vpop.f32.mrb[4].mxu0  ;;  %v396_v45 = vpop.f32.mrb[4].mxu1 }
  0xe6   :  { %300 = vst.msk [vmem:[%s542_s3 + $0xc] sm:$0xf] %vm296_vm2, %v355_v40  ;;  %308 = vst.msk [vmem:[%s542_s3 + $0x2c] sm:$0xf] %vm296_vm2, %v363_v41  ;;  %v178_v46 = vadd.f32 %v388_v44, %v317_v11  ;;  %v210_v47 = vadd.f32 %v396_v45, %v317_v11  ;;  %v169_v48 = vpop.f32.mrb[5].mxu0  ;;  %v201_v49 = vpop.f32.mrb[5].mxu1 }
  0xe7   :  { %298 = vst.msk [vmem:[%s542_s3 + $0x4] sm:$0xf] %vm296_vm2, %v353_v42  ;;  %306 = vst.msk [vmem:[%s542_s3 + $0x24] sm:$0xf] %vm296_vm2, %v361_v43  ;;  %v170_v50 = vadd.f32 %v317_v11, %v169_v48  ;;  %v202_v51 = vadd.f32 %v317_v11, %v201_v49  ;;  %v389_v52 = vpop.f32.mrb[6].mxu0  ;;  %v397_v53 = vpop.f32.mrb[6].mxu1 }
  0xe8   :  { %v222_v54 = vmax.f32 %v178_v46, 0.0  ;;  %v230_v55 = vmax.f32 %v210_v47, 0.0  ;;  %v181_v56 = vadd.f32 %v389_v52, %v317_v11  ;;  %v213_v57 = vadd.f32 %v397_v53, %v317_v11  ;;  %v172_v58 = vpop.f32.mrb[7].mxu0  ;;  %v204_v59 = vpop.f32.mrb[7].mxu1 }
  0xe9   :  { %v220_v60 = vmax.f32 %v170_v50, 0.0  ;;  %v228_v61 = vmax.f32 %v202_v51, 0.0  ;;  %v173_v62 = vadd.f32 %v317_v11, %v172_v58  ;;  %v205_v63 = vadd.f32 %v317_v11, %v204_v59 }
  0xea   :  { %v358_v0 = vpack.c.bf16 %v222_v54, %v222_v54  ;;  %v366_v1 = vpack.c.bf16 %v230_v55, %v230_v55  ;;  %v223_v2 = vmax.f32 %v181_v56, 0.0  ;;  %v231_v3 = vmax.f32 %v213_v57, 0.0 }
  0xeb   :  { %v356_v4 = vpack.c.bf16 %v220_v60, %v220_v60  ;;  %v364_v5 = vpack.c.bf16 %v228_v61, %v228_v61  ;;  %v221_v6 = vmax.f32 %v173_v62, 0.0  ;;  %v229_v7 = vmax.f32 %v205_v63, 0.0 }
  0xec   :  { %303 = vst.msk [vmem:[%s542_s3 + $0x18] sm:$0xf] %vm296_vm2, %v358_v0  ;;  %311 = vst.msk [vmem:[%s542_s3 + $0x38] sm:$0xf] %vm296_vm2, %v366_v1  ;;  %v359_v8 = vpack.c.bf16 %v223_v2, %v223_v2  ;;  %v367_v9 = vpack.c.bf16 %v231_v3, %v231_v3 }
  0xed   :  { %301 = vst.msk [vmem:[%s542_s3 + $0x10] sm:$0xf] %vm296_vm2, %v356_v4  ;;  %309 = vst.msk [vmem:[%s542_s3 + $0x30] sm:$0xf] %vm296_vm2, %v364_v5  ;;  %v357_v10 = vpack.c.bf16 %v221_v6, %v221_v6  ;;  %v365_v11 = vpack.c.bf16 %v229_v7, %v229_v7 }
  0xee   :  { %304 = vst.msk [vmem:[%s542_s3 + $0x1c] sm:$0xf] %vm296_vm2, %v359_v8  ;;  %312 = vst.msk [vmem:[%s542_s3 + $0x3c] sm:$0xf] %vm296_vm2, %v367_v9 }
  0xef   :  { %302 = vst.msk [vmem:[%s542_s3 + $0x14] sm:$0xf] %vm296_vm2, %v357_v10  ;;  %310 = vst.msk [vmem:[%s542_s3 + $0x34] sm:$0xf] %vm296_vm2, %v365_v11 }

// kernel: _lambda_.24
= control target key start
LH: loop header
LB: loop body
LE: loop exit
PB: predicated region body
PF: predicated region fallthrough
CT: control target
= control target key end

     0   :  { %vm118_vm0 = vcmask 1043456   ;;  %vm93_vm1 = vcmask 195584   ;;  %vm347_vm2 = vcmask 60416   ;;  %s708_s1 = inlined_call_operand.vmem [shape: bf16[24,8], index: 1, kind: input, shape index: {}]   ;;  %s709_s0 = inlined_call_operand.vmem [shape: bf16[128,24], index: 0, kind: input, shape index: {}]   ;;  %s710_s3 = inlined_call_operand.vmem [shape: bf16[128,8], index: 3, kind: input, shape index: {}]   ;;  %s711_s2 = inlined_call_operand.vmem [shape: f32[1,8], index: 2, kind: input, shape index: {}]   ;;  %s712_s4 = inlined_call_operand.vmem [shape: bf16[128,8], index: 4, kind: output, shape index: {}]  }
   0x1   :  { %v494_v0 = vld [vmem:[%s708_s1] sm:$0xff]   ;;  %v495_v1 = vld [vmem:[%s708_s1 + $0x8] ss:$0 sps:$4 sm:$0xff]   ;;  %v500_v7 = vld [vmem:[%s709_s0 + $0x10] sm:$0xff]  }
   0x2   :  { %468 = vmatprep.subr.bf16.mxu0 %v494_v0  ;;  %488 = vmatprep.subr.bf16.mxu1 %v494_v0  ;;  %v496_v2 = vld [vmem:[%s709_s0] sm:$0xff]   ;;  %v120_v4 = vsel %vm118_vm0, %v495_v1, 0  ;;  %v498_v5 = vld [vmem:[%s709_s0 + $0x8] sm:$0xff]   ;;  %v501_v8 = vld [vmem:[%s709_s0 + $0x30] sm:$0xff]  }
   0x3   :  { %469 = vmatpush3.bf16.msra.mxu0 %v494_v0  ;;  %490 = vmatpush3.bf16.msra.mxu1 %v494_v0  ;;  %v497_v3 = vld [vmem:[%s709_s0 + $0x20] sm:$0xff]   ;;  %v499_v6 = vld [vmem:[%s709_s0 + $0x28] sm:$0xff]   ;;  %v502_v9 = vld [vmem:[%s709_s0 + $0x18] sm:$0xff]  }
   0x4   :  { %492 = vmatprep.subr.msk.bf16.mxu0 %vm118_vm0, %v495_v1  ;;  %493 = vmatprep.subr.msk.bf16.mxu1 %vm118_vm0, %v495_v1  ;;  %v503_v10 = vld [vmem:[%s709_s0 + $0x38] sm:$0xff]   ;;  %v451_v11 = vld [vmem:[%s710_s3 + $0x8] sm:$0xff]   ;;  %v420_v13 = vld [vmem:[%s710_s3] sm:$0xff]  }
   0x5   :  { %472 = vmatprep.mubr.msk.bf16.mxu0 %vm93_vm1, %v496_v2  ;;  %480 = vmatprep.mubr.msk.bf16.mxu1 %vm93_vm1, %v497_v3  ;;  %v455_v12 = vld [vmem:[%s710_s3 + $0x28] sm:$0xff]   ;;  %v454_v14 = vld [vmem:[%s710_s3 + $0x20] sm:$0xff]   ;;  %v582_v15 = vld [vmem:[%s710_s3 + $0x18] sm:$0xff]   ;;  %v425_v16 = vunpack.c.l.bf16 %v451_v11  ;;  %v421_v22 = vunpack.c.l.bf16 %v420_v13  ;;  %v426_v24 = vunpack.c.h.bf16 %v451_v11  ;;  %v422_v26 = vunpack.c.h.bf16 %v420_v13 }
   0x6   :  { %v587_v17 = vld [vmem:[%s710_s3 + $0x38] sm:$0xff]   ;;  %v592_v18 = vld [vmem:[%s710_s3 + $0x10] sm:$0xff]   ;;  %v602_v20 = vld [vmem:[%s711_s2] ss:$0 sm:$0xff]  ;;  %v441_v21 = vunpack.c.l.bf16 %v455_v12  ;;  %v437_v23 = vunpack.c.l.bf16 %v454_v14  ;;  %v442_v25 = vunpack.c.h.bf16 %v455_v12  ;;  %v438_v27 = vunpack.c.h.bf16 %v454_v14 }
   0x7   :  { %471 = vmatpush3.bf16.msra.mxu0 %v120_v4  ;;  %491 = vmatpush3.bf16.msra.mxu1 %v120_v4  ;;  %v597_v19 = vld [vmem:[%s710_s3 + $0x30] sm:$0xff]   ;;  %v433_v30 = vunpack.c.l.bf16 %v582_v15  ;;  %v449_v31 = vunpack.c.l.bf16 %v587_v17  ;;  %v429_v32 = vunpack.c.l.bf16 %v592_v18  ;;  %v434_v38 = vunpack.c.h.bf16 %v582_v15 }
   0x8   :  { %v445_v33 = vunpack.c.l.bf16 %v597_v19  ;;  %v450_v39 = vunpack.c.h.bf16 %v587_v17  ;;  %v430_v44 = vunpack.c.h.bf16 %v592_v18  ;;  %v446_v45 = vunpack.c.h.bf16 %v597_v19 }
   0xa   :  { %473 = vmatmul.mubr.msk.bf16.vlgmr.msra.gmra.mrb[0].mxu0 %vm93_vm1, %v498_v5  ;;  %481 = vmatmul.mubr.msk.bf16.vlgmr.msra.gmra.mrb[0].mxu1 %vm93_vm1, %v499_v6 }
   0xb   :  { %476 = vmatprep.mubr.msk.bf16.mxu0 %vm93_vm1, %v500_v7  ;;  %484 = vmatprep.mubr.msk.bf16.mxu1 %vm93_vm1, %v501_v8 }
  0x12   :  { %477 = vmatmul.mubr.msk.bf16.gmra.mrb[4].mxu0 %vm93_vm1, %v502_v9  ;;  %485 = vmatmul.mubr.msk.bf16.gmra.mrb[4].mxu1 %vm93_vm1, %v503_v10 }
  0xdd   :  { %v474_v28 = vpop.f32.mrb[0].mxu0  ;;  %v482_v29 = vpop.f32.mrb[0].mxu1 }
  0xde   :  { %v165_v34 = vadd.f32 %v474_v28, %v602_v20  ;;  %v197_v35 = vadd.f32 %v482_v29, %v602_v20  ;;  %v156_v36 = vpop.f32.mrb[1].mxu0  ;;  %v188_v37 = vpop.f32.mrb[1].mxu1 }
  0xdf   :  { %v157_v40 = vadd.f32 %v602_v20, %v156_v36  ;;  %v189_v41 = vadd.f32 %v602_v20, %v188_v37  ;;  %v475_v42 = vpop.f32.mrb[2].mxu0  ;;  %v483_v43 = vpop.f32.mrb[2].mxu1 }
  0xe0   :  { %v253_v46 = vadd.f32 %v425_v16, %v165_v34  ;;  %v261_v47 = vadd.f32 %v441_v21, %v197_v35  ;;  %v168_v48 = vadd.f32 %v475_v42, %v602_v20  ;;  %v200_v49 = vadd.f32 %v483_v43, %v602_v20  ;;  %v159_v50 = vpop.f32.mrb[3].mxu0  ;;  %v191_v51 = vpop.f32.mrb[3].mxu1 }
  0xe1   :  { %v251_v52 = vadd.f32 %v421_v22, %v157_v40  ;;  %v259_v53 = vadd.f32 %v437_v23, %v189_v41  ;;  %v160_v54 = vadd.f32 %v602_v20, %v159_v50  ;;  %v192_v55 = vadd.f32 %v602_v20, %v191_v51 }
  0xe2   :  { %v269_v56 = vmax.f32 %v253_v46, 0.0  ;;  %v277_v57 = vmax.f32 %v261_v47, 0.0  ;;  %v254_v58 = vadd.f32 %v426_v24, %v168_v48  ;;  %v262_v59 = vadd.f32 %v442_v25, %v200_v49 }
  0xe3   :  { %v267_v60 = vmax.f32 %v251_v52, 0.0  ;;  %v275_v61 = vmax.f32 %v259_v53, 0.0  ;;  %v252_v62 = vadd.f32 %v422_v26, %v160_v54  ;;  %v260_v63 = vadd.f32 %v438_v27, %v192_v55 }
  0xe4   :  { %v405_v0 = vpack.c.bf16 %v269_v56, %v269_v56  ;;  %v413_v1 = vpack.c.bf16 %v277_v57, %v277_v57  ;;  %v270_v2 = vmax.f32 %v254_v58, 0.0  ;;  %v278_v3 = vmax.f32 %v262_v59, 0.0 }
  0xe5   :  { %v403_v4 = vpack.c.bf16 %v267_v60, %v267_v60  ;;  %v411_v5 = vpack.c.bf16 %v275_v61, %v275_v61  ;;  %v268_v6 = vmax.f32 %v252_v62, 0.0  ;;  %v276_v7 = vmax.f32 %v260_v63, 0.0  ;;  %v478_v8 = vpop.f32.mrb[4].mxu0  ;;  %v486_v9 = vpop.f32.mrb[4].mxu1 }
  0xe6   :  { %350 = vst.msk [vmem:[%s712_s4 + $0x8] sm:$0xf] %vm347_vm2, %v405_v0  ;;  %358 = vst.msk [vmem:[%s712_s4 + $0x28] sm:$0xf] %vm347_vm2, %v413_v1  ;;  %v406_v10 = vpack.c.bf16 %v270_v2, %v270_v2  ;;  %v414_v11 = vpack.c.bf16 %v278_v3, %v278_v3  ;;  %v181_v12 = vadd.f32 %v478_v8, %v602_v20  ;;  %v172_v14 = vpop.f32.mrb[5].mxu0  ;;  %v204_v16 = vpop.f32.mrb[5].mxu1 }
  0xe7   :  { %v213_v13 = vadd.f32 %v486_v9, %v602_v20  ;;  %348 = vst.msk [vmem:[%s712_s4] sm:$0xf] %vm347_vm2, %v403_v4  ;;  %356 = vst.msk [vmem:[%s712_s4 + $0x20] sm:$0xf] %vm347_vm2, %v411_v5  ;;  %v404_v21 = vpack.c.bf16 %v268_v6, %v268_v6  ;;  %v412_v22 = vpack.c.bf16 %v276_v7, %v276_v7  ;;  %v479_v25 = vpop.f32.mrb[6].mxu0  ;;  %v487_v26 = vpop.f32.mrb[6].mxu1 }
  0xe8   :  { %v173_v23 = vadd.f32 %v602_v20, %v172_v14  ;;  %v205_v24 = vadd.f32 %v602_v20, %v204_v16  ;;  %351 = vst.msk [vmem:[%s712_s4 + $0xc] sm:$0xf] %vm347_vm2, %v406_v10  ;;  %359 = vst.msk [vmem:[%s712_s4 + $0x2c] sm:$0xf] %vm347_vm2, %v414_v11  ;;  %v257_v27 = vadd.f32 %v433_v30, %v181_v12  ;;  %v175_v35 = vpop.f32.mrb[7].mxu0  ;;  %v207_v36 = vpop.f32.mrb[7].mxu1 }
  0xe9   :  { %v265_v28 = vadd.f32 %v449_v31, %v213_v13  ;;  %v184_v29 = vadd.f32 %v479_v25, %v602_v20  ;;  %v216_v34 = vadd.f32 %v487_v26, %v602_v20  ;;  %349 = vst.msk [vmem:[%s712_s4 + $0x4] sm:$0xf] %vm347_vm2, %v404_v21  ;;  %357 = vst.msk [vmem:[%s712_s4 + $0x24] sm:$0xf] %vm347_vm2, %v412_v22 }
  0xea   :  { %v255_v30 = vadd.f32 %v429_v32, %v173_v23  ;;  %v263_v31 = vadd.f32 %v445_v33, %v205_v24  ;;  %v176_v37 = vadd.f32 %v602_v20, %v175_v35  ;;  %v208_v40 = vadd.f32 %v602_v20, %v207_v36 }
  0xeb   :  { %v273_v41 = vmax.f32 %v257_v27, 0.0  ;;  %v281_v42 = vmax.f32 %v265_v28, 0.0  ;;  %v258_v43 = vadd.f32 %v434_v38, %v184_v29  ;;  %v266_v46 = vadd.f32 %v450_v39, %v216_v34 }
  0xec   :  { %v271_v47 = vmax.f32 %v255_v30, 0.0  ;;  %v279_v48 = vmax.f32 %v263_v31, 0.0  ;;  %v256_v32 = vadd.f32 %v430_v44, %v176_v37  ;;  %v264_v33 = vadd.f32 %v446_v45, %v208_v40 }
  0xed   :  { %v409_v49 = vpack.c.bf16 %v273_v41, %v273_v41  ;;  %v417_v50 = vpack.c.bf16 %v281_v42, %v281_v42  ;;  %v274_v51 = vmax.f32 %v258_v43, 0.0  ;;  %v282_v20 = vmax.f32 %v266_v46, 0.0 }
  0xee   :  { %v407_v52 = vpack.c.bf16 %v271_v47, %v271_v47  ;;  %v415_v53 = vpack.c.bf16 %v279_v48, %v279_v48  ;;  %v272_v54 = vmax.f32 %v256_v32, 0.0  ;;  %v280_v15 = vmax.f32 %v264_v33, 0.0 }
  0xef   :  { %354 = vst.msk [vmem:[%s712_s4 + $0x18] sm:$0xf] %vm347_vm2, %v409_v49  ;;  %362 = vst.msk [vmem:[%s712_s4 + $0x38] sm:$0xf] %vm347_vm2, %v417_v50  ;;  %v410_v17 = vpack.c.bf16 %v274_v51, %v274_v51  ;;  %v418_v18 = vpack.c.bf16 %v282_v20, %v282_v20 }
  0xf0   :  { %352 = vst.msk [vmem:[%s712_s4 + $0x10] sm:$0xf] %vm347_vm2, %v407_v52  ;;  %360 = vst.msk [vmem:[%s712_s4 + $0x30] sm:$0xf] %vm347_vm2, %v415_v53  ;;  %v408_v19 = vpack.c.bf16 %v272_v54, %v272_v54  ;;  %v416_v38 = vpack.c.bf16 %v280_v15, %v280_v15 }
  0xf1   :  { %355 = vst.msk [vmem:[%s712_s4 + $0x1c] sm:$0xf] %vm347_vm2, %v410_v17  ;;  %363 = vst.msk [vmem:[%s712_s4 + $0x3c] sm:$0xf] %vm347_vm2, %v418_v18 }
  0xf2   :  { %353 = vst.msk [vmem:[%s712_s4 + $0x14] sm:$0xf] %vm347_vm2, %v408_v19  ;;  %361 = vst.msk [vmem:[%s712_s4 + $0x34] sm:$0xf] %vm347_vm2, %v416_v38 }

// kernel: _lambda_.25
= control target key start
LH: loop header
LB: loop body
LE: loop exit
PB: predicated region body
PF: predicated region fallthrough
CT: control target
= control target key end

     0   :  { %vm86_vm0 = vcmask 588800   ;;  %s420_s13 = smov 104   ;;  %s422_s18 = smov 96   ;;  %vm93_vm1 = vcmask 1043456   ;;  %vm181_vm8 = vcmask 60416   ;;  %s545_s0 = inlined_call_operand.vmem [shape: bf16[32,72], index: 0, kind: input, shape index: {}]   ;;  %s546_s1 = inlined_call_operand.vmem [shape: bf16[72,8], index: 1, kind: input, shape index: {}]   ;;  %s547_s3 = inlined_call_operand.vmem [shape: f32[1,8], index: 3, kind: input, shape index: {}]   ;;  %s548_s4 = inlined_call_operand.vmem [shape: f32[1,8], index: 4, kind: input, shape index: {}, may-alias: {2,4}]   ;;  %s549_s6 = inlined_call_operand.vmem [shape: f32[1,8], index: 6, kind: input, shape index: {}, may-alias: {5,6}]   ;;  %s550_s2 = inlined_call_operand.vmem [shape: f32[1,8], index: 2, kind: input, shape index: {}, may-alias: {2,4}]   ;;  %s551_s5 = inlined_call_operand.vmem [shape: f32[1,8], index: 5, kind: input, shape index: {}, may-alias: {5,6}]   ;;  %s552_s7 = inlined_call_operand.vmem [shape: bf16[32,8], index: 7, kind: output, shape index: {0}]   ;;  %s553_s8 = inlined_call_operand.vmem [shape: bf16[32,8], index: 8, kind: output, shape index: {1}]  }
   0x1   :  { %v29_v0 = vld [vmem:[%s545_s0] sm:$0xff]   ;;  %v31_v1 = vld [vmem:[%s545_s0 + $0x8] sm:$0xff]   ;;  %s421_s0 = smov 120   ;;  %v413_v10 = vld [vmem:[%s546_s1 + $0x10] sm:$0xff]   ;;  %s423_s25 = smov 32  }
   0x2   :  { %v186_v2 = vunpack.c.l.bf16 %v29_v0  ;;  %v187_v3 = vunpack.c.h.bf16 %v29_v0  ;;  %v188_v4 = vunpack.c.l.bf16 %v31_v1  ;;  %v189_v5 = vunpack.c.h.bf16 %v31_v1  ;;  %v411_v6 = vld [vmem:[%s546_s1] sm:$0xff]   ;;  %v412_v7 = vld [vmem:[%s546_s1 + $0x8] sm:$0xff]   ;;  %372 = vmatprep.mubr.msk.bf16.mxu0 %vm86_vm0, %v29_v0  ;;  %v414_v11 = vld [vmem:[%s546_s1 + $0x18] sm:$0xff]  }
   0x3   :  { %362 = vmatprep.subr.bf16.mxu0 %v411_v6  ;;  %v415_v12 = vld [vmem:[%s546_s1 + $0x20] ss:$0 sps:$4 sm:$0xff]  }
   0x4   :  { %v391_v8 = vpack.i.bf16 %v187_v3, %v186_v2  ;;  %363 = vmatpush3.bf16.msra.mxu0 %v411_v6  ;;  %v396_v9 = vpack.i.bf16 %v189_v5, %v188_v4  ;;  %v340_v13 = vld [vmem:[%s547_s3] ss:$0 sm:$0xff]  ;;  %v95_v15 = vsel %vm93_vm1, %v415_v12, 0 }
   0x5   :  { %364 = vmatprep.subr.bf16.mxu0 %v412_v7  ;;  %v341_v14 = vld [vmem:[%s548_s4] ss:$0 sm:$0xff] }
   0x6   :  { %392 = vrot.lane.b32.xlu1 %v391_v8, %s420_s13  ;;  %382 = vrot.lane.b32.xlu0 %v391_v8, %s421_s0  ;;  %v342_v16 = vld [vmem:[%s549_s6] ss:$0 sm:$0xff] }
   0x7   :  { %v325_v6 = vld [vmem:[%s550_s2] ss:$0 sm:$0xff] }
   0x8   :  { %365 = vmatpush3.bf16.msra.mxu0 %v412_v7 }
   0x9   :  { %366 = vmatprep.subr.bf16.mxu0 %v413_v10 }
   0xa   :  { %397 = vrot.lane.b32.xlu1 %v396_v9, %s420_s13  ;;  %387 = vrot.lane.b32.xlu0 %v396_v9, %s421_s0 }
   0xc   :  { %367 = vmatpush3.bf16.msra.mxu0 %v413_v10 }
   0xd   :  { %368 = vmatprep.subr.bf16.mxu0 %v414_v11 }
   0xe   :  { %407 = vrot.lane.b32.xlu1 %v396_v9, %s422_s18  ;;  %402 = vrot.lane.b32.xlu0 %v391_v8, %s422_s18  ;;  %v335_v8 = vld [vmem:[%s551_s5] ss:$0 sm:$0xff] }
  0x10   :  { %369 = vmatpush3.bf16.msra.mxu0 %v414_v11 }
  0x11   :  { %376 = vmatprep.subr.msk.bf16.mxu0 %vm93_vm1, %v415_v12 }
  0x12   :  { %248 = vrot.lane.b32.xlu0 %v340_v13, %s423_s25  ;;  %261 = vrot.lane.b32.xlu1 %v341_v14, %s423_s25 }
  0x14   :  { %371 = vmatpush3.bf16.msra.mxu0 %v95_v15 }
  0x16   :  { %278 = vrot.lane.b32.xlu0 %v342_v16, %s423_s25 }
  0x17   :  { %373 = vmatmul.mubr.msk.bf16.vlgmr.msra.gmra.mrb[0].mxu0 %vm86_vm0, %v31_v1 }
  0x78   :  { %v393_v17 = vpop.permute.xlu1 %392  ;;  %v383_v18 = vpop.permute.xlu0 %382 }
  0x79   :  { %v385_v19 = vunpack.i.h.bf16 %v383_v18  ;;  %v384_v20 = vunpack.i.l.bf16 %v383_v18  ;;  %v395_v27 = vunpack.i.h.bf16 %v393_v17  ;;  %v394_v28 = vunpack.i.l.bf16 %v393_v17 }
  0x7b   :  { %v207_v29 = vmax.f32 %v187_v3, %v385_v19  ;;  %v206_v30 = vmax.f32 %v186_v2, %v384_v20 }
  0x7c   :  { %v398_v21 = vpop.permute.xlu1 %397  ;;  %v388_v22 = vpop.permute.xlu0 %387 }
  0x7d   :  { %v400_v23 = vunpack.i.h.bf16 %v398_v21  ;;  %v399_v24 = vunpack.i.l.bf16 %v398_v21  ;;  %v390_v25 = vunpack.i.h.bf16 %v388_v22  ;;  %v389_v26 = vunpack.i.l.bf16 %v388_v22 }
  0x7e   :  { %v222_v41 = vmax.f32 %v206_v30, %v394_v28  ;;  %v223_v42 = vmax.f32 %v207_v29, %v395_v27 }
  0x7f   :  { %v209_v31 = vmax.f32 %v189_v5, %v390_v25  ;;  %v208_v32 = vmax.f32 %v188_v4, %v389_v26 }
  0x80   :  { %v408_v33 = vpop.permute.xlu1 %407  ;;  %v403_v34 = vpop.permute.xlu0 %402 }
  0x81   :  { %v410_v35 = vunpack.i.h.bf16 %v408_v33  ;;  %v409_v36 = vunpack.i.l.bf16 %v408_v33  ;;  %v224_v37 = vmax.f32 %v208_v32, %v399_v24  ;;  %v225_v38 = vmax.f32 %v209_v31, %v400_v23 }
  0x82   :  { %v405_v39 = vunpack.i.h.bf16 %v403_v34  ;;  %v404_v40 = vunpack.i.l.bf16 %v403_v34 }
  0x83   :  { %v240_v43 = vmax.f32 %v224_v37, %v409_v36  ;;  %v241_v44 = vmax.f32 %v225_v38, %v410_v35 }
  0x84   :  { %v238_v45 = vmax.f32 %v222_v41, %v404_v40  ;;  %v239_v46 = vmax.f32 %v223_v42, %v405_v39  ;;  %v249_v47 = vpop.permute.xlu0 %248  ;;  %v262_v48 = vpop.permute.xlu1 %261 }
  0x85   :  { %v253_v49 = vmul.f32 %v249_v47, %v240_v43  ;;  %v254_v50 = vmul.f32 %v249_v47, %v241_v44 }
  0x86   :  { %v251_v51 = vmul.f32 %v249_v47, %v238_v45  ;;  %v252_v52 = vmul.f32 %v249_v47, %v239_v46 }
  0x87   :  { %v266_v53 = vadd.f32 %v262_v48, %v253_v49  ;;  %v267_v54 = vadd.f32 %v262_v48, %v254_v50 }
  0x88   :  { %v264_v55 = vadd.f32 %v262_v48, %v251_v51  ;;  %v265_v56 = vadd.f32 %v262_v48, %v252_v52  ;;  %v279_v57 = vpop.permute.xlu0 %278 }
  0x89   :  { %v283_v58 = vmul.f32 %v279_v57, %v266_v53  ;;  %v284_v59 = vmul.f32 %v279_v57, %v267_v54  ;;  %vm271_vm4 = vcmp.ge.f32.partialorder %v267_v54, 0.0  ;;  %vm270_vm5 = vcmp.ge.f32.partialorder %v266_v53, 0.0 }
  0x8a   :  { %v281_v60 = vmul.f32 %v279_v57, %v264_v55  ;;  %v282_v61 = vmul.f32 %v279_v57, %v265_v56  ;;  %vm269_vm2 = vcmp.ge.f32.partialorder %v265_v56, 0.0  ;;  %vm268_vm3 = vcmp.ge.f32.partialorder %v264_v55, 0.0 }
  0x8b   :  { %v288_v2 = vsel %vm271_vm4, %v267_v54, %v284_v59  ;;  %v287_v3 = vsel %vm270_vm5, %v266_v53, %v283_v58 }
  0x8c   :  { %v286_v62 = vsel %vm269_vm2, %v265_v56, %v282_v61  ;;  %v285_v63 = vsel %vm268_vm3, %v264_v55, %v281_v60  ;;  %v354_v4 = vpack.c.bf16 %v288_v2, %v288_v2  ;;  %v353_v5 = vpack.c.bf16 %v287_v3, %v287_v3 }
  0x8d   :  { %v352_v0 = vpack.c.bf16 %v286_v62, %v286_v62  ;;  %v351_v1 = vpack.c.bf16 %v285_v63, %v285_v63 }
  0x8f   :  { %303 = vrot.lane.b32.xlu0 %v352_v0, %s422_s18  ;;  %301 = vrot.lane.b32.xlu1 %v351_v1, %s422_s18 }
  0x93   :  { %307 = vrot.lane.b32.xlu0 %v354_v4, %s422_s18  ;;  %305 = vrot.lane.b32.xlu1 %v353_v5, %s422_s18 }
  0xea   :  { %v374_v7 = vpop.f32.mrb[0].mxu0 }
  0xeb   :  { %v140_v9 = vadd.f32 %v374_v7, %v325_v6  ;;  %v131_v10 = vpop.f32.mrb[1].mxu0 }
  0xec   :  { %v132_v11 = vadd.f32 %v325_v6, %v131_v10  ;;  %v375_v12 = vpop.f32.mrb[2].mxu0 }
  0xed   :  { %vm148_vm6 = vcmp.ge.f32.partialorder %v140_v9, 0.0  ;;  %v159_v13 = vmul.f32 %v335_v8, %v140_v9  ;;  %v143_v14 = vadd.f32 %v375_v12, %v325_v6  ;;  %v134_v15 = vpop.f32.mrb[3].mxu0 }
  0xee   :  { %vm146_vm7 = vcmp.ge.f32.partialorder %v132_v11, 0.0  ;;  %v157_v16 = vmul.f32 %v335_v8, %v132_v11  ;;  %v135_v17 = vadd.f32 %v325_v6, %v134_v15 }
  0xef   :  { %v163_v18 = vsel %vm148_vm6, %v140_v9, %v159_v13  ;;  %vm149_vm9 = vcmp.ge.f32.partialorder %v143_v14, 0.0  ;;  %v160_v19 = vmul.f32 %v335_v8, %v143_v14 }
  0xf0   :  { %v349_v20 = vpack.c.bf16 %v163_v18, %v163_v18  ;;  %v161_v21 = vsel %vm146_vm7, %v132_v11, %v157_v16  ;;  %vm147_vm10 = vcmp.ge.f32.partialorder %v135_v17, 0.0  ;;  %v158_v22 = vmul.f32 %v335_v8, %v135_v17 }
  0xf1   :  { %v347_v23 = vpack.c.bf16 %v161_v21, %v161_v21  ;;  %v164_v24 = vsel %vm149_vm9, %v143_v14, %v160_v19 }
  0xf2   :  { %184 = vst.msk [vmem:[%s552_s7 + $0x8] sm:$0xf] %vm181_vm8, %v349_v20  ;;  %v350_v25 = vpack.c.bf16 %v164_v24, %v164_v24  ;;  %v162_v26 = vsel %vm147_vm10, %v135_v17, %v158_v22 }
  0xf3   :  { %182 = vst.msk [vmem:[%s552_s7] sm:$0xf] %vm181_vm8, %v347_v23  ;;  %v348_v27 = vpack.c.bf16 %v162_v26, %v162_v26 }
  0xf4   :  { %185 = vst.msk [vmem:[%s552_s7 + $0xc] sm:$0xf] %vm181_vm8, %v350_v25 }
  0xf5   :  { %183 = vst.msk [vmem:[%s552_s7 + $0x4] sm:$0xf] %vm181_vm8, %v348_v27 }
 0x101   :  { %v304_v28 = vpop.permute.xlu0 %303  ;;  %v302_v29 = vpop.permute.xlu1 %301 }
 0x102   :  { %314 = vst.msk [vmem:[%s553_s8 + $0x4] sm:$0xf] %vm181_vm8, %v304_v28  ;;  %313 = vst.msk [vmem:[%s553_s8] sm:$0xf] %vm181_vm8, %v302_v29 }
 0x105   :  { %v308_v30 = vpop.permute.xlu0 %307  ;;  %v306_v31 = vpop.permute.xlu1 %305 }
 0x106   :  { %316 = vst.msk [vmem:[%s553_s8 + $0xc] sm:$0xf] %vm181_vm8, %v308_v30  ;;  %315 = vst.msk [vmem:[%s553_s8 + $0x8] sm:$0xf] %vm181_vm8, %v306_v31 }

// kernel: _lambda_.26
= control target key start
LH: loop header
LB: loop body
LE: loop exit
PB: predicated region body
PF: predicated region fallthrough
CT: control target
= control target key end

     0   :  { %vm60_vm0 = vcmask 392192   ;;  %vm136_vm1 = vcmask 125952   ;;  %s231_s1 = inlined_call_operand.vmem [shape: bf16[48,16], index: 1, kind: input, shape index: {}]   ;;  %s232_s0 = inlined_call_operand.vmem [shape: bf16[32,48], index: 0, kind: input, shape index: {}]   ;;  %s233_s2 = inlined_call_operand.vmem [shape: f32[1,16], index: 2, kind: input, shape index: {}]   ;;  %s234_s3 = inlined_call_operand.vmem [shape: bf16[32,16], index: 3, kind: output, shape index: {}]  }
   0x1   :  { %v176_v0 = vld [vmem:[%s231_s1] sm:$0xff]   ;;  %v177_v1 = vld [vmem:[%s231_s1 + $0x8] sm:$0xff]   ;;  %v178_v3 = vld [vmem:[%s231_s1 + $0x10] sm:$0xff]  }
   0x2   :  { %166 = vmatprep.subr.bf16.mxu0 %v176_v0  ;;  %v179_v2 = vld [vmem:[%s232_s0] sm:$0xff]   ;;  %v180_v4 = vld [vmem:[%s232_s0 + $0x8] sm:$0xff]  }
   0x3   :  { %167 = vmatpush3.bf16.msra.mxu0 %v176_v0  ;;  %172 = vmatprep.mubr.msk.bf16.mxu0 %vm60_vm0, %v179_v2  ;;  %v145_v5 = vld [vmem:[%s233_s2] ss:$0 sm:$0xff] }
   0x4   :  { %168 = vmatprep.subr.bf16.mxu0 %v177_v1 }
   0x7   :  { %169 = vmatpush3.bf16.msra.mxu0 %v177_v1 }
   0x8   :  { %170 = vmatprep.subr.bf16.mxu0 %v178_v3 }
   0xb   :  { %171 = vmatpush3.bf16.msra.mxu0 %v178_v3 }
   0xe   :  { %173 = vmatmul.mubr.msk.bf16.vlgmr.msra.gmra.mrb[0].mxu0 %vm60_vm0, %v180_v4 }
  0xe1   :  { %v174_v6 = vpop.f32.mrb[0].mxu0 }
  0xe2   :  { %v110_v7 = vadd.f32 %v174_v6, %v145_v5  ;;  %v101_v8 = vpop.f32.mrb[1].mxu0 }
  0xe3   :  { %v102_v9 = vadd.f32 %v145_v5, %v101_v8  ;;  %v175_v10 = vpop.f32.mrb[2].mxu0 }
  0xe4   :  { %v118_v11 = vmax.f32 %v110_v7, 0.0  ;;  %v113_v12 = vadd.f32 %v175_v10, %v145_v5  ;;  %v104_v13 = vpop.f32.mrb[3].mxu0 }
  0xe5   :  { %v116_v14 = vmax.f32 %v102_v9, 0.0  ;;  %v105_v15 = vadd.f32 %v145_v5, %v104_v13 }
  0xe6   :  { %v159_v16 = vpack.c.bf16 %v118_v11, %v118_v11  ;;  %v119_v17 = vmax.f32 %v113_v12, 0.0 }
  0xe7   :  { %v157_v18 = vpack.c.bf16 %v116_v14, %v116_v14  ;;  %v117_v19 = vmax.f32 %v105_v15, 0.0 }
  0xe8   :  { %139 = vst.msk [vmem:[%s234_s3 + $0x8] sm:$0xf] %vm136_vm1, %v159_v16  ;;  %v160_v20 = vpack.c.bf16 %v119_v17, %v119_v17 }
  0xe9   :  { %137 = vst.msk [vmem:[%s234_s3] sm:$0xf] %vm136_vm1, %v157_v18  ;;  %v158_v21 = vpack.c.bf16 %v117_v19, %v117_v19 }
  0xea   :  { %140 = vst.msk [vmem:[%s234_s3 + $0xc] sm:$0xf] %vm136_vm1, %v160_v20 }
  0xeb   :  { %138 = vst.msk [vmem:[%s234_s3 + $0x4] sm:$0xf] %vm136_vm1, %v158_v21 }

// kernel: _lambda_.31
= control target key start
LH: loop header
LB: loop body
LE: loop exit
PB: predicated region body
PF: predicated region fallthrough
CT: control target
= control target key end

     0   :  { %vm60_vm0 = vcmask 392192   ;;  %vm132_vm1 = vcmask 125952   ;;  %s227_s1 = inlined_call_operand.vmem [shape: bf16[48,16], index: 1, kind: input, shape index: {}]   ;;  %s228_s0 = inlined_call_operand.vmem [shape: bf16[32,48], index: 0, kind: input, shape index: {}]   ;;  %s229_s2 = inlined_call_operand.vmem [shape: f32[1,16], index: 2, kind: input, shape index: {}]   ;;  %s230_s3 = inlined_call_operand.vmem [shape: bf16[32,16], index: 3, kind: output, shape index: {}]  }
   0x1   :  { %v172_v0 = vld [vmem:[%s227_s1] sm:$0xff]   ;;  %v173_v1 = vld [vmem:[%s227_s1 + $0x8] sm:$0xff]   ;;  %v174_v3 = vld [vmem:[%s227_s1 + $0x10] sm:$0xff]  }
   0x2   :  { %162 = vmatprep.subr.bf16.mxu0 %v172_v0  ;;  %v175_v2 = vld [vmem:[%s228_s0] sm:$0xff]   ;;  %v176_v4 = vld [vmem:[%s228_s0 + $0x8] sm:$0xff]  }
   0x3   :  { %163 = vmatpush3.bf16.msra.mxu0 %v172_v0  ;;  %168 = vmatprep.mubr.msk.bf16.mxu0 %vm60_vm0, %v175_v2  ;;  %v141_v5 = vld [vmem:[%s229_s2] ss:$0 sm:$0xff] }
   0x4   :  { %164 = vmatprep.subr.bf16.mxu0 %v173_v1 }
   0x7   :  { %165 = vmatpush3.bf16.msra.mxu0 %v173_v1 }
   0x8   :  { %166 = vmatprep.subr.bf16.mxu0 %v174_v3 }
   0xb   :  { %167 = vmatpush3.bf16.msra.mxu0 %v174_v3 }
   0xe   :  { %169 = vmatmul.mubr.msk.bf16.vlgmr.msra.gmra.mrb[0].mxu0 %vm60_vm0, %v176_v4 }
  0xe1   :  { %v170_v6 = vpop.f32.mrb[0].mxu0 }
  0xe2   :  { %v110_v7 = vadd.f32 %v170_v6, %v141_v5  ;;  %v101_v8 = vpop.f32.mrb[1].mxu0 }
  0xe3   :  { %v102_v9 = vadd.f32 %v141_v5, %v101_v8  ;;  %v171_v10 = vpop.f32.mrb[2].mxu0 }
  0xe4   :  { %v155_v11 = vpack.c.bf16 %v110_v7, %v110_v7  ;;  %v113_v12 = vadd.f32 %v171_v10, %v141_v5  ;;  %v104_v13 = vpop.f32.mrb[3].mxu0 }
  0xe5   :  { %v153_v14 = vpack.c.bf16 %v102_v9, %v102_v9  ;;  %v105_v15 = vadd.f32 %v141_v5, %v104_v13 }
  0xe6   :  { %135 = vst.msk [vmem:[%s230_s3 + $0x8] sm:$0xf] %vm132_vm1, %v155_v11  ;;  %v156_v16 = vpack.c.bf16 %v113_v12, %v113_v12 }
  0xe7   :  { %133 = vst.msk [vmem:[%s230_s3] sm:$0xf] %vm132_vm1, %v153_v14  ;;  %v154_v17 = vpack.c.bf16 %v105_v15, %v105_v15 }
  0xe8   :  { %136 = vst.msk [vmem:[%s230_s3 + $0xc] sm:$0xf] %vm132_vm1, %v156_v16 }
  0xe9   :  { %134 = vst.msk [vmem:[%s230_s3 + $0x4] sm:$0xf] %vm132_vm1, %v154_v17 }

// kernel: _lambda_.33
= control target key start
LH: loop header
LB: loop body
LE: loop exit
PB: predicated region body
PF: predicated region fallthrough
CT: control target
= control target key end

     0   :  { %vm69_vm0 = vcmask 392192   ;;  %vm181_vm1 = vcmask 125952   ;;  %s336_s1 = inlined_call_operand.vmem [shape: bf16[48,16], index: 1, kind: input, shape index: {}]   ;;  %s337_s0 = inlined_call_operand.vmem [shape: bf16[32,48], index: 0, kind: input, shape index: {}]   ;;  %s338_s3 = inlined_call_operand.vmem [shape: bf16[32,16], index: 3, kind: input, shape index: {}]   ;;  %s339_s2 = inlined_call_operand.vmem [shape: f32[1,16], index: 2, kind: input, shape index: {}]   ;;  %s340_s4 = inlined_call_operand.vmem [shape: bf16[32,16], index: 4, kind: input, shape index: {}]   ;;  %s341_s5 = inlined_call_operand.vmem [shape: bf16[32,16], index: 5, kind: input, shape index: {}]   ;;  %s342_s6 = inlined_call_operand.vmem [shape: bf16[32,16], index: 6, kind: output, shape index: {}]  }
   0x1   :  { %v248_v0 = vld [vmem:[%s336_s1] sm:$0xff]   ;;  %v249_v1 = vld [vmem:[%s336_s1 + $0x8] sm:$0xff]   ;;  %v250_v3 = vld [vmem:[%s336_s1 + $0x10] sm:$0xff]  }
   0x2   :  { %238 = vmatprep.subr.bf16.mxu0 %v248_v0  ;;  %v251_v2 = vld [vmem:[%s337_s0] sm:$0xff]   ;;  %v252_v4 = vld [vmem:[%s337_s0 + $0x8] sm:$0xff]  }
   0x3   :  { %239 = vmatpush3.bf16.msra.mxu0 %v248_v0  ;;  %244 = vmatprep.mubr.msk.bf16.mxu0 %vm69_vm0, %v251_v2  ;;  %v230_v5 = vld [vmem:[%s338_s3 + $0x8] sm:$0xff]   ;;  %v207_v6 = vld [vmem:[%s338_s3] sm:$0xff]  }
   0x4   :  { %240 = vmatprep.subr.bf16.mxu0 %v249_v1  ;;  %v190_v7 = vld [vmem:[%s339_s2] ss:$0 sm:$0xff]  ;;  %v231_v8 = vld [vmem:[%s340_s4 + $0x8] sm:$0xff]   ;;  %v212_v9 = vunpack.c.l.bf16 %v230_v5  ;;  %v208_v13 = vunpack.c.l.bf16 %v207_v6  ;;  %v213_v18 = vunpack.c.h.bf16 %v230_v5  ;;  %v209_v22 = vunpack.c.h.bf16 %v207_v6 }
   0x5   :  { %v215_v10 = vld [vmem:[%s340_s4] sm:$0xff]   ;;  %v232_v12 = vld [vmem:[%s341_s5 + $0x8] sm:$0xff]   ;;  %v220_v15 = vunpack.c.l.bf16 %v231_v8  ;;  %v221_v26 = vunpack.c.h.bf16 %v231_v8 }
   0x6   :  { %v223_v17 = vld [vmem:[%s341_s5] sm:$0xff]   ;;  %v216_v20 = vunpack.c.l.bf16 %v215_v10  ;;  %v228_v24 = vunpack.c.l.bf16 %v232_v12  ;;  %v217_v31 = vunpack.c.h.bf16 %v215_v10  ;;  %v229_v34 = vunpack.c.h.bf16 %v232_v12 }
   0x7   :  { %241 = vmatpush3.bf16.msra.mxu0 %v249_v1  ;;  %v224_v29 = vunpack.c.l.bf16 %v223_v17  ;;  %v225_v37 = vunpack.c.h.bf16 %v223_v17 }
   0x8   :  { %242 = vmatprep.subr.bf16.mxu0 %v250_v3 }
   0xb   :  { %243 = vmatpush3.bf16.msra.mxu0 %v250_v3 }
   0xe   :  { %245 = vmatmul.mubr.msk.bf16.vlgmr.msra.gmra.mrb[0].mxu0 %vm69_vm0, %v252_v4 }
  0xe1   :  { %v246_v11 = vpop.f32.mrb[0].mxu0 }
  0xe2   :  { %v119_v14 = vadd.f32 %v246_v11, %v190_v7  ;;  %v110_v16 = vpop.f32.mrb[1].mxu0 }
  0xe3   :  { %v111_v19 = vadd.f32 %v190_v7, %v110_v16  ;;  %v247_v21 = vpop.f32.mrb[2].mxu0 }
  0xe4   :  { %v135_v23 = vadd.f32 %v212_v9, %v119_v14  ;;  %v122_v25 = vadd.f32 %v247_v21, %v190_v7  ;;  %v113_v27 = vpop.f32.mrb[3].mxu0 }
  0xe5   :  { %v133_v28 = vadd.f32 %v208_v13, %v111_v19  ;;  %v114_v30 = vadd.f32 %v190_v7, %v113_v27 }
  0xe6   :  { %v147_v32 = vadd.f32 %v220_v15, %v135_v23  ;;  %v136_v33 = vadd.f32 %v213_v18, %v122_v25 }
  0xe7   :  { %v145_v35 = vadd.f32 %v216_v20, %v133_v28  ;;  %v134_v36 = vadd.f32 %v209_v22, %v114_v30 }
  0xe8   :  { %v159_v38 = vadd.f32 %v228_v24, %v147_v32  ;;  %v148_v39 = vadd.f32 %v221_v26, %v136_v33 }
  0xe9   :  { %v157_v40 = vadd.f32 %v224_v29, %v145_v35  ;;  %v146_v41 = vadd.f32 %v217_v31, %v134_v36 }
  0xea   :  { %v163_v42 = vmax.f32 %v159_v38, 0.0  ;;  %v160_v43 = vadd.f32 %v229_v34, %v148_v39 }
  0xeb   :  { %v161_v44 = vmax.f32 %v157_v40, 0.0  ;;  %v158_v45 = vadd.f32 %v225_v37, %v146_v41 }
  0xec   :  { %v204_v46 = vpack.c.bf16 %v163_v42, %v163_v42  ;;  %v164_v47 = vmax.f32 %v160_v43, 0.0 }
  0xed   :  { %v202_v48 = vpack.c.bf16 %v161_v44, %v161_v44  ;;  %v162_v49 = vmax.f32 %v158_v45, 0.0 }
  0xee   :  { %184 = vst.msk [vmem:[%s342_s6 + $0x8] sm:$0xf] %vm181_vm1, %v204_v46  ;;  %v205_v50 = vpack.c.bf16 %v164_v47, %v164_v47 }
  0xef   :  { %182 = vst.msk [vmem:[%s342_s6] sm:$0xf] %vm181_vm1, %v202_v48  ;;  %v203_v51 = vpack.c.bf16 %v162_v49, %v162_v49 }
  0xf0   :  { %185 = vst.msk [vmem:[%s342_s6 + $0xc] sm:$0xf] %vm181_vm1, %v205_v50 }
  0xf1   :  { %183 = vst.msk [vmem:[%s342_s6 + $0x4] sm:$0xf] %vm181_vm1, %v203_v51 }

// kernel: _lambda_.34
= control target key start
LH: loop header
LB: loop body
LE: loop exit
PB: predicated region body
PF: predicated region fallthrough
CT: control target
= control target key end

     0   :  { %vm68_vm0 = vcmask 523264   ;;  %vm144_vm1 = vcmask 257024   ;;  %s247_s1 = inlined_call_operand.vmem [shape: bf16[64,32], index: 1, kind: input, shape index: {}]   ;;  %s248_s0 = inlined_call_operand.vmem [shape: bf16[32,64], index: 0, kind: input, shape index: {}]   ;;  %s249_s2 = inlined_call_operand.vmem [shape: f32[1,32], index: 2, kind: input, shape index: {}]   ;;  %s250_s3 = inlined_call_operand.vmem [shape: bf16[32,32], index: 3, kind: output, shape index: {}]  }
   0x1   :  { %v188_v0 = vld [vmem:[%s247_s1] sm:$0xff]   ;;  %v189_v1 = vld [vmem:[%s247_s1 + $0x8] sm:$0xff]   ;;  %v190_v2 = vld [vmem:[%s247_s1 + $0x10] sm:$0xff]  }
   0x2   :  { %176 = vmatprep.subr.bf16.mxu0 %v188_v0  ;;  %v192_v3 = vld [vmem:[%s248_s0] sm:$0xff]   ;;  %v191_v4 = vld [vmem:[%s247_s1 + $0x18] sm:$0xff]   ;;  %v193_v5 = vld [vmem:[%s248_s0 + $0x8] sm:$0xff]  }
   0x3   :  { %177 = vmatpush3.bf16.msra.mxu0 %v188_v0  ;;  %184 = vmatprep.mubr.msk.bf16.mxu0 %vm68_vm0, %v192_v3  ;;  %v153_v6 = vld [vmem:[%s249_s2] ss:$0 sm:$0xff] }
   0x4   :  { %178 = vmatprep.subr.bf16.mxu0 %v189_v1 }
   0x7   :  { %179 = vmatpush3.bf16.msra.mxu0 %v189_v1 }
   0x8   :  { %180 = vmatprep.subr.bf16.mxu0 %v190_v2 }
   0xb   :  { %181 = vmatpush3.bf16.msra.mxu0 %v190_v2 }
   0xc   :  { %182 = vmatprep.subr.bf16.mxu0 %v191_v4 }
   0xf   :  { %183 = vmatpush3.bf16.msra.mxu0 %v191_v4 }
  0x12   :  { %185 = vmatmul.mubr.msk.bf16.vlgmr.msra.gmra.mrb[0].mxu0 %vm68_vm0, %v193_v5 }
  0xe5   :  { %v186_v7 = vpop.f32.mrb[0].mxu0 }
  0xe6   :  { %v118_v8 = vadd.f32 %v186_v7, %v153_v6  ;;  %v109_v9 = vpop.f32.mrb[1].mxu0 }
  0xe7   :  { %v110_v10 = vadd.f32 %v153_v6, %v109_v9  ;;  %v187_v11 = vpop.f32.mrb[2].mxu0 }
  0xe8   :  { %v126_v12 = vmax.f32 %v118_v8, 0.0  ;;  %v121_v13 = vadd.f32 %v187_v11, %v153_v6  ;;  %v112_v14 = vpop.f32.mrb[3].mxu0 }
  0xe9   :  { %v124_v15 = vmax.f32 %v110_v10, 0.0  ;;  %v113_v16 = vadd.f32 %v153_v6, %v112_v14 }
  0xea   :  { %v168_v17 = vpack.c.bf16 %v126_v12, %v126_v12  ;;  %v127_v18 = vmax.f32 %v121_v13, 0.0 }
  0xeb   :  { %v166_v19 = vpack.c.bf16 %v124_v15, %v124_v15  ;;  %v125_v20 = vmax.f32 %v113_v16, 0.0 }
  0xec   :  { %147 = vst.msk [vmem:[%s250_s3 + $0x8] sm:$0xf] %vm144_vm1, %v168_v17  ;;  %v169_v21 = vpack.c.bf16 %v127_v18, %v127_v18 }
  0xed   :  { %145 = vst.msk [vmem:[%s250_s3] sm:$0xf] %vm144_vm1, %v166_v19  ;;  %v167_v22 = vpack.c.bf16 %v125_v20, %v125_v20 }
  0xee   :  { %148 = vst.msk [vmem:[%s250_s3 + $0xc] sm:$0xf] %vm144_vm1, %v169_v21 }
  0xef   :  { %146 = vst.msk [vmem:[%s250_s3 + $0x4] sm:$0xf] %vm144_vm1, %v167_v22 }

// kernel: _lambda_.39
= control target key start
LH: loop header
LB: loop body
LE: loop exit
PB: predicated region body
PF: predicated region fallthrough
CT: control target
= control target key end

     0   :  { %vm104_vm0 = vcmask 1043456   ;;  %vm79_vm1 = vcmask 64512   ;;  %vm205_vm2 = vcmask 130048   ;;  %s404_s1 = inlined_call_operand.vmem [shape: bf16[8,16], index: 1, kind: input, shape index: {}]   ;;  %s405_s0 = inlined_call_operand.vmem [shape: bf16[128,8], index: 0, kind: input, shape index: {}]   ;;  %s406_s2 = inlined_call_operand.vmem [shape: f32[1,16], index: 2, kind: input, shape index: {}]   ;;  %s407_s3 = inlined_call_operand.vmem [shape: f32[128,16], index: 3, kind: output, shape index: {}]  }
   0x1   :  { %v31_v0 = vld [vmem:[%s404_s1] sm:$0xf]  ;;  %v276_v4 = vld [vmem:[%s405_s0 + $0x8] sm:$0xff]   ;;  %v278_v6 = vld [vmem:[%s405_s0 + $0x10] sm:$0xff]  }
   0x2   :  { %272 = vmatprep.subr.msk.bf16.mxu0 %vm104_vm0, %v31_v0  ;;  %273 = vmatprep.subr.msk.bf16.mxu1 %vm104_vm0, %v31_v0  ;;  %v106_v1 = vsel %vm104_vm0, %v31_v0, 0  ;;  %v274_v2 = vld [vmem:[%s405_s0] sm:$0xff]   ;;  %v277_v5 = vld [vmem:[%s405_s0 + $0x28] sm:$0xff]   ;;  %v279_v7 = vld [vmem:[%s405_s0 + $0x30] sm:$0xff]  }
   0x3   :  { %253 = vmatpush3.bf16.msra.mxu0 %v106_v1  ;;  %271 = vmatpush3.bf16.msra.mxu1 %v106_v1  ;;  %v275_v3 = vld [vmem:[%s405_s0 + $0x20] sm:$0xff]   ;;  %v280_v8 = vld [vmem:[%s405_s0 + $0x18] sm:$0xff]  }
   0x4   :  { %254 = vmatprep.mubr.msk.bf16.mxu0 %vm79_vm1, %v274_v2  ;;  %262 = vmatprep.mubr.msk.bf16.mxu1 %vm79_vm1, %v275_v3  ;;  %v281_v9 = vld [vmem:[%s405_s0 + $0x38] sm:$0xff]   ;;  %v226_v10 = vld [vmem:[%s406_s2] ss:$0 sm:$0xff] }
   0x6   :  { %255 = vmatmul.mubr.msk.bf16.vlgmr.msra.gmra.mrb[0].mxu0 %vm79_vm1, %v276_v4  ;;  %263 = vmatmul.mubr.msk.bf16.vlgmr.msra.gmra.mrb[0].mxu1 %vm79_vm1, %v277_v5 }
   0x7   :  { %258 = vmatprep.mubr.msk.bf16.mxu0 %vm79_vm1, %v278_v6  ;;  %266 = vmatprep.mubr.msk.bf16.mxu1 %vm79_vm1, %v279_v7 }
   0xe   :  { %259 = vmatmul.mubr.msk.bf16.gmra.mrb[4].mxu0 %vm79_vm1, %v280_v8  ;;  %267 = vmatmul.mubr.msk.bf16.gmra.mrb[4].mxu1 %vm79_vm1, %v281_v9 }
  0xd9   :  { %v256_v11 = vpop.f32.mrb[0].mxu0  ;;  %v264_v13 = vpop.f32.mrb[0].mxu1 }
  0xda   :  { %v151_v12 = vadd.f32 %v256_v11, %v226_v10  ;;  %v142_v14 = vpop.f32.mrb[1].mxu0  ;;  %v183_v15 = vadd.f32 %v264_v13, %v226_v10  ;;  %v174_v17 = vpop.f32.mrb[1].mxu1 }
  0xdb   :  { %v143_v16 = vadd.f32 %v226_v10, %v142_v14  ;;  %v257_v18 = vpop.f32.mrb[2].mxu0  ;;  %v175_v19 = vadd.f32 %v226_v10, %v174_v17  ;;  %v265_v21 = vpop.f32.mrb[2].mxu1 }
  0xdc   :  { %208 = vst.msk [vmem:[%s407_s3 + $0x10] sm:$0xff] %vm205_vm2, %v151_v12  ;;  %v154_v20 = vadd.f32 %v257_v18, %v226_v10  ;;  %v145_v22 = vpop.f32.mrb[3].mxu0  ;;  %216 = vst.msk [vmem:[%s407_s3 + $0x50] sm:$0xff] %vm205_vm2, %v183_v15  ;;  %v186_v23 = vadd.f32 %v265_v21, %v226_v10  ;;  %v177_v25 = vpop.f32.mrb[3].mxu1 }
  0xdd   :  { %206 = vst.msk [vmem:[%s407_s3] sm:$0xff] %vm205_vm2, %v143_v16  ;;  %v146_v24 = vadd.f32 %v226_v10, %v145_v22  ;;  %214 = vst.msk [vmem:[%s407_s3 + $0x40] sm:$0xff] %vm205_vm2, %v175_v19  ;;  %v178_v26 = vadd.f32 %v226_v10, %v177_v25 }
  0xde   :  { %209 = vst.msk [vmem:[%s407_s3 + $0x18] sm:$0xff] %vm205_vm2, %v154_v20  ;;  %217 = vst.msk [vmem:[%s407_s3 + $0x58] sm:$0xff] %vm205_vm2, %v186_v23 }
  0xdf   :  { %207 = vst.msk [vmem:[%s407_s3 + $0x8] sm:$0xff] %vm205_vm2, %v146_v24  ;;  %215 = vst.msk [vmem:[%s407_s3 + $0x48] sm:$0xff] %vm205_vm2, %v178_v26 }
  0xe1   :  { %v260_v27 = vpop.f32.mrb[4].mxu0  ;;  %v268_v29 = vpop.f32.mrb[4].mxu1 }
  0xe2   :  { %v167_v28 = vadd.f32 %v260_v27, %v226_v10  ;;  %v158_v30 = vpop.f32.mrb[5].mxu0  ;;  %v199_v31 = vadd.f32 %v268_v29, %v226_v10  ;;  %v190_v33 = vpop.f32.mrb[5].mxu1 }
  0xe3   :  { %v159_v32 = vadd.f32 %v226_v10, %v158_v30  ;;  %v261_v34 = vpop.f32.mrb[6].mxu0  ;;  %v191_v35 = vadd.f32 %v226_v10, %v190_v33  ;;  %v269_v37 = vpop.f32.mrb[6].mxu1 }
  0xe4   :  { %212 = vst.msk [vmem:[%s407_s3 + $0x30] sm:$0xff] %vm205_vm2, %v167_v28  ;;  %v170_v36 = vadd.f32 %v261_v34, %v226_v10  ;;  %v161_v38 = vpop.f32.mrb[7].mxu0  ;;  %220 = vst.msk [vmem:[%s407_s3 + $0x70] sm:$0xff] %vm205_vm2, %v199_v31  ;;  %v202_v39 = vadd.f32 %v269_v37, %v226_v10  ;;  %v193_v41 = vpop.f32.mrb[7].mxu1 }
  0xe5   :  { %210 = vst.msk [vmem:[%s407_s3 + $0x20] sm:$0xff] %vm205_vm2, %v159_v32  ;;  %v162_v40 = vadd.f32 %v226_v10, %v161_v38  ;;  %218 = vst.msk [vmem:[%s407_s3 + $0x60] sm:$0xff] %vm205_vm2, %v191_v35  ;;  %v194_v42 = vadd.f32 %v226_v10, %v193_v41 }
  0xe6   :  { %213 = vst.msk [vmem:[%s407_s3 + $0x38] sm:$0xff] %vm205_vm2, %v170_v36  ;;  %221 = vst.msk [vmem:[%s407_s3 + $0x78] sm:$0xff] %vm205_vm2, %v202_v39 }
  0xe7   :  { %211 = vst.msk [vmem:[%s407_s3 + $0x28] sm:$0xff] %vm205_vm2, %v162_v40  ;;  %219 = vst.msk [vmem:[%s407_s3 + $0x68] sm:$0xff] %vm205_vm2, %v194_v42 }

</bundles_post_ra>
